<compile_context>
chip_gen: v6e
topology: v6e:2x2x1
jax: 0.10.0
libtpu: 0.0.40
codegen_flags: <defaults>
</compile_context>

<pallas_src>
import jax
import jax.numpy as jnp
from jax.experimental import pallas as pl
from jax.experimental.pallas import tpu as pltpu

_SMOOTH = 0.001       # both focal and bce criteria are built with smooth=0.001
_EPS = 1e-8
_CLAMP_MAX = 100.0
_PROB_CH = (0, 3, 6, 9, 12, 15)
_VEC_CH = (1, 2, 4, 5, 7, 8, 10, 11, 13, 14, 16, 17)


def _sigmoid(x):
    # Exact sigmoid: matches torch.sigmoid + the downstream 1e-8 clamps.
    # (Kept exact instead of pl.reciprocal(approx=True) so the f32 result matches
    #  the PyTorch reference tightly; the divide lowers to EUP anyway and the
    #  kernel is HBM-bound.)
    return 1.0 / (1.0 + jnp.exp(-x))


def _detector_loss_kernel(pred_loc_ref, gt_loc_ref, valid_ref,
                          pred_dir_ref, gt_dir_ref,
                          out_ref,
                          acc_wv, acc_focal, acc_bce, acc_gv, acc_num):
    t = pl.program_id(1)

    @pl.when(t == 0)
    def _init():
        acc_wv[...] = jnp.zeros_like(acc_wv)
        acc_focal[...] = jnp.zeros_like(acc_focal)
        acc_bce[...] = jnp.zeros_like(acc_bce)
        acc_gv[...] = jnp.zeros_like(acc_gv)
        acc_num[...] = jnp.zeros_like(acc_num)

    f32 = jnp.float32
    pred_loc = pred_loc_ref[...].astype(f32)     # (B, T)
    gt_loc = gt_loc_ref[...].astype(f32)         # (B, T)
    valid = valid_ref[...].astype(f32)           # (B, T)

    # weight = deepcopy(gt_location_feat); weight[weight == 0] = 0.002
    weight = jnp.where(gt_loc == 0.0, 0.002, gt_loc)
    wv = weight * valid

    # ---------- focal (loss_loc): Weighted_ModifiedFocalLossWithSigmoid ----------
    gt_copy = jnp.maximum(gt_loc - 2.0 * _SMOOTH, 0.0) + _SMOOTH
    p = jnp.maximum(_sigmoid(pred_loc), _EPS)
    pos = (1.0 - p) ** 2 * gt_copy ** 4 * jnp.log(p)
    neg = p ** 2 * (1.0 - gt_copy) ** 4 * jnp.log(jnp.maximum(1.0 - p, _EPS))
    focal = -(weight * (pos + neg)) * valid

    # ---------- BCE (loss_dir_prob) over the 6 probability channels ----------
    # Sum over channels first, multiply once by weight*valid (identical math,
    # no channel-broadcast of the (B,T) weight).
    bce_c = jnp.zeros_like(pred_loc)
    for c in _PROB_CH:
        x = pred_dir_ref[:, c, :].astype(f32)    # (B, T)
        g = gt_dir_ref[:, c, :].astype(f32)
        sp = _sigmoid(x)
        bce_c = bce_c - (jnp.log(jnp.maximum(sp, _EPS)) * g
                         + jnp.log(jnp.maximum(1.0 - sp, _EPS)) * (1.0 - g))
    bce = bce_c * wv

    # ---------- MSE (loss_dir_vec) over the 12 vector channels ----------
    tem = jnp.zeros_like(pred_loc)
    for c in _VEC_CH:
        d = pred_dir_ref[:, c, :].astype(f32) - gt_dir_ref[:, c, :].astype(f32)
        tem = tem + d * d
    # PyTorch broadcasting quirk ((B,H,W)*(B,1,H,W) -> (B,B,H,W)) factorizes per
    # spatial position as (sum_b tem) * (sum_b gt*valid^2); positions are
    # independent, so tiling S keeps this exact.
    tem_sum = jnp.sum(tem, axis=0, keepdims=True)                      # (1, T)
    wvv_sum = jnp.sum(gt_loc * valid * valid, axis=0, keepdims=True)   # (1, T)

    def _s(x):                                   # full reduce -> (1, 1)
        return jnp.sum(x, axis=(0, 1), keepdims=True)

    acc_wv[...] += _s(wv)
    acc_focal[...] += _s(focal)
    acc_bce[...] += _s(bce)
    acc_gv[...] += _s(gt_loc * valid)
    acc_num[...] += _s(tem_sum * wvv_sum)

    # ---------- epilogue: emit this half's raw partial sums ----------
    @pl.when(t == pl.num_programs(1) - 1)
    def _finalize():
        lane = jax.lax.broadcasted_iota(jnp.int32, (1, 1, 8), 2)
        row = (jnp.where(lane == 0, acc_wv[...], 0.0)
               + jnp.where(lane == 1, acc_focal[...], 0.0)
               + jnp.where(lane == 2, acc_bce[...], 0.0)
               + jnp.where(lane == 3, acc_gv[...], 0.0)
               + jnp.where(lane == 4, acc_num[...], 0.0))
        out_ref[...] = row


def detector_loss(pred_location_feat, pred_direction_feat,
                  gt_location_feat, gt_direction_feat, valid_masks,
                  lambda_loc=1.0, lambda_dir_prob=1.0, lambda_dir_vec=1.0,
                  tile_s=2048):
    """DetectorLoss.forward -> (loss_loc, loss_dir_prob, loss_dir_vec, loss_sum)."""
    B, _, H, W = pred_location_feat.shape
    C_dir = pred_direction_feat.shape[1]
    S = H * W

    # Reshape only — keep the caller's dtype (bf16 inputs halve HBM traffic;
    # the kernel upcasts to f32 internally).
    pred_loc = jnp.reshape(pred_location_feat, (B, S))
    gt_loc = jnp.reshape(gt_location_feat, (B, S))
    valid = jnp.reshape(valid_masks, (B, S))
    pred_dir = jnp.reshape(pred_direction_feat, (B, C_dir, S))
    gt_dir = jnp.reshape(gt_direction_feat, (B, C_dir, S))

    # Spatial tiling: lane-dim tiles are multiples of 128; two "parallel" halves
    # so v7x's second TensorCore gets the other half of the reduction.
    tile = max(128, (int(tile_s) // 128) * 128)
    tile = min(tile, ((S + 127) // 128) * 128)
    num_tiles = -(-S // tile)
    nth = -(-num_tiles // 2)            # tiles per half
    s_pad = 2 * nth * tile

    def pad(x):
        if s_pad == S:
            return x
        cfg = [(0, 0)] * (x.ndim - 1) + [(0, s_pad - S)]
        # zero padding: padded positions carry valid=0 / gt=0 => contribute nothing
        return jnp.pad(x, cfg)

    args = tuple(pad(x) for x in (pred_loc, gt_loc, valid, pred_dir, gt_dir))

    loc_spec = pl.BlockSpec((B, tile), lambda h, t: (0, h * nth + t))
    dir_spec = pl.BlockSpec((B, C_dir, tile), lambda h, t: (0, 0, h * nth + t))

    grid_spec = pltpu.PrefetchScalarGridSpec(
        num_scalar_prefetch=0,
        grid=(2, nth),
        in_specs=[loc_spec, loc_spec, loc_spec, dir_spec, dir_spec],
        out_specs=pl.BlockSpec((1, 1, 8), lambda h, t: (h, 0, 0)),
        scratch_shapes=[pltpu.VMEM((1, 1), jnp.float32) for _ in range(5)],
    )

    partials = pl.pallas_call(
        _detector_loss_kernel,
        out_shape=jax.ShapeDtypeStruct((2, 1, 8), jnp.float32),
        grid_spec=grid_spec,
        compiler_params=pltpu.CompilerParams(
            dimension_semantics=("parallel", "arbitrary")),
    )(*args)

    # Combine the two per-core halves; finish with the divides / clamps (scalars).
    sums = jnp.sum(partials[:, 0, :], axis=0)            # (8,)
    s_wv, s_focal, s_bce, s_gv, s_num = sums[0], sums[1], sums[2], sums[3], sums[4]
    den = jnp.maximum(s_wv, _EPS)
    loss_loc = jnp.minimum(s_focal / den, _CLAMP_MAX)
    loss_dir_prob = jnp.minimum(s_bce / den, _CLAMP_MAX)
    loss_dir_vec = jnp.minimum(s_num / jnp.maximum(s_gv, _EPS), _CLAMP_MAX)
    loss_sum = (lambda_loc * loss_loc + lambda_dir_prob * loss_dir_prob
                + lambda_dir_vec * loss_dir_vec)
    return loss_loc, loss_dir_prob, loss_dir_vec, loss_sum


def _reference(pred_loc, pred_dir, gt_loc, gt_dir, valid):
    """Plain-JAX transcription of the PyTorch forward (verification only)."""
    weight = jnp.where(gt_loc == 0.0, 0.002, gt_loc)
    den = jnp.maximum(jnp.sum(weight * valid), _EPS)

    # focal (loc)
    gt_copy = jnp.maximum(gt_loc - 2.0 * _SMOOTH, 0.0) + _SMOOTH
    p = jnp.maximum(jax.nn.sigmoid(pred_loc), _EPS)
    pos = (1.0 - p) ** 2 * gt_copy ** 4 * jnp.log(p)
    neg = p ** 2 * (1.0 - gt_copy) ** 4 * jnp.log(jnp.maximum(1.0 - p, _EPS))
    loss = -weight * (pos + neg) * valid
    loss_loc = jnp.minimum(jnp.sum(loss) / den, _CLAMP_MAX)

    # bce (dir prob)
    pp, gp = pred_dir[:, list(_PROB_CH)], gt_dir[:, list(_PROB_CH)]
    sp = jax.nn.sigmoid(pp)
    l2 = -(jnp.log(jnp.maximum(sp, _EPS)) * gp
           + jnp.log(jnp.maximum(1.0 - sp, _EPS)) * (1.0 - gp))
    l2 = l2 * weight * valid
    loss_prob = jnp.minimum(jnp.sum(l2) / den, _CLAMP_MAX)

    # mse (dir vec) — literal torch-style broadcasting
    pv, gv = pred_dir[:, list(_VEC_CH)], gt_dir[:, list(_VEC_CH)]
    tem = jnp.sum((pv - gv) ** 2, axis=1)      # (B,H,W)
    tem = tem * valid                          # -> (B,B,H,W), matches torch broadcast
    num = jnp.sum(tem * gt_loc * valid)
    den3 = jnp.maximum(jnp.sum(gt_loc * valid), _EPS)
    loss_vec = jnp.minimum(num / den3, _CLAMP_MAX)

    return loss_loc, loss_prob, loss_vec, loss_loc + loss_prob + loss_vec


if __name__ == "__main__":
    key = jax.random.PRNGKey(0)
    B, H, W = 2, 32, 32                       # S=1024 -> grid=(2, 4) with tile_s=128
    k = jax.random.split(key, 5)

    pred_loc = jax.random.normal(k[0], (B, 1, H, W), jnp.float32)
    raw = jax.random.uniform(k[1], (B, 1, H, W), jnp.float32)
    gt_loc = jnp.where(raw > 0.7, raw, 0.0)                    # sparse heatmap-like GT
    pred_dir = jax.random.normal(k[2], (B, 18, H, W), jnp.float32)
    gt_dir = jax.random.uniform(k[3], (B, 18, H, W), jnp.float32)
    valid = (jax.random.uniform(k[4], (B, 1, H, W)) > 0.2).astype(jnp.float32)

    outs = detector_loss(pred_loc, pred_dir, gt_loc, gt_dir, valid, tile_s=128)
    outs = jax.block_until_ready(outs)

    refs = _reference(pred_loc, pred_dir, gt_loc, gt_dir, valid)
    for got, want in zip(outs, refs):
        assert jnp.allclose(got, want, rtol=1e-3, atol=1e-4), (got, want)

    print("KERNEL_OK")
</pallas_src>

<mosaic_0001>
module attributes {stable_mosaic.version = 11 : i64} {
  func.func @_detector_loss_kernel(%arg0: i32, %arg1: i32, %arg2: memref<2x128xf32, #tpu.memory_space<vmem>>, %arg3: memref<2x128xf32, #tpu.memory_space<vmem>>, %arg4: memref<2x128xf32, #tpu.memory_space<vmem>>, %arg5: memref<2x18x128xf32, #tpu.memory_space<vmem>>, %arg6: memref<2x18x128xf32, #tpu.memory_space<vmem>>, %arg7: memref<1x1x8xf32, #tpu.memory_space<vmem>>, %arg8: memref<1x1xf32, #tpu.memory_space<vmem>>, %arg9: memref<1x1xf32, #tpu.memory_space<vmem>>, %arg10: memref<1x1xf32, #tpu.memory_space<vmem>>, %arg11: memref<1x1xf32, #tpu.memory_space<vmem>>, %arg12: memref<1x1xf32, #tpu.memory_space<vmem>>) attributes {dimension_semantics = [#tpu.dimension_semantics<parallel>, #tpu.dimension_semantics<arbitrary>], iteration_bounds = array<i64: 2, 4>, scalar_prefetch = 0 : i64, scratch_operands = 5 : i64, tpu.core_type = #tpu.core_type<tc>, window_params = [{transform_indices = @transform_0, window_bounds = array<i64: 2, 128>}, {transform_indices = @transform_1, window_bounds = array<i64: 2, 128>}, {transform_indices = @transform_2, window_bounds = array<i64: 2, 128>}, {transform_indices = @transform_3, window_bounds = array<i64: 2, 18, 128>}, {transform_indices = @transform_4, window_bounds = array<i64: 2, 18, 128>}, {transform_indices = @transform_5, window_bounds = array<i64: 1, 1, 8>}]} {
    %c0_i32 = arith.constant 0 : i32
    %0 = arith.cmpi eq, %arg1, %c0_i32 : i32
    %1 = arith.extui %0 : i1 to i32
    %c0_i32_0 = arith.constant 0 : i32
    %2 = arith.cmpi ne, %1, %c0_i32_0 : i32
    scf.if %2 {
      %cst_182 = arith.constant 0.000000e+00 : f32
      %339 = vector.broadcast %cst_182 : f32 to vector<1x1xf32>
      %c0_183 = arith.constant 0 : index
      %c0_184 = arith.constant 0 : index
      %340 = vector.load %arg8[%c0_183, %c0_184] : memref<1x1xf32, #tpu.memory_space<vmem>>, vector<1x1xf32>
      tpu.vector_store %arg8[%c0_183, %c0_184], %339 {strides = array<i32>} : memref<1x1xf32, #tpu.memory_space<vmem>>, vector<1x1xf32>,
      %cst_185 = arith.constant 0.000000e+00 : f32
      %341 = vector.broadcast %cst_185 : f32 to vector<1x1xf32>
      %c0_186 = arith.constant 0 : index
      %c0_187 = arith.constant 0 : index
      %342 = vector.load %arg9[%c0_186, %c0_187] : memref<1x1xf32, #tpu.memory_space<vmem>>, vector<1x1xf32>
      tpu.vector_store %arg9[%c0_186, %c0_187], %341 {strides = array<i32>} : memref<1x1xf32, #tpu.memory_space<vmem>>, vector<1x1xf32>,
      %cst_188 = arith.constant 0.000000e+00 : f32
      %343 = vector.broadcast %cst_188 : f32 to vector<1x1xf32>
      %c0_189 = arith.constant 0 : index
      %c0_190 = arith.constant 0 : index
      %344 = vector.load %arg10[%c0_189, %c0_190] : memref<1x1xf32, #tpu.memory_space<vmem>>, vector<1x1xf32>
      tpu.vector_store %arg10[%c0_189, %c0_190], %343 {strides = array<i32>} : memref<1x1xf32, #tpu.memory_space<vmem>>, vector<1x1xf32>,
      %cst_191 = arith.constant 0.000000e+00 : f32
      %345 = vector.broadcast %cst_191 : f32 to vector<1x1xf32>
      %c0_192 = arith.constant 0 : index
      %c0_193 = arith.constant 0 : index
      %346 = vector.load %arg11[%c0_192, %c0_193] : memref<1x1xf32, #tpu.memory_space<vmem>>, vector<1x1xf32>
      tpu.vector_store %arg11[%c0_192, %c0_193], %345 {strides = array<i32>} : memref<1x1xf32, #tpu.memory_space<vmem>>, vector<1x1xf32>,
      %cst_194 = arith.constant 0.000000e+00 : f32
      %347 = vector.broadcast %cst_194 : f32 to vector<1x1xf32>
      %c0_195 = arith.constant 0 : index
      %c0_196 = arith.constant 0 : index
      %348 = vector.load %arg12[%c0_195, %c0_196] : memref<1x1xf32, #tpu.memory_space<vmem>>, vector<1x1xf32>
      tpu.vector_store %arg12[%c0_195, %c0_196], %347 {strides = array<i32>} : memref<1x1xf32, #tpu.memory_space<vmem>>, vector<1x1xf32>,
    } else {
    }
    %c0 = arith.constant 0 : index
    %c0_1 = arith.constant 0 : index
    %3 = vector.load %arg2[%c0, %c0_1] : memref<2x128xf32, #tpu.memory_space<vmem>>, vector<2x128xf32>
    %c0_2 = arith.constant 0 : index
    %c0_3 = arith.constant 0 : index
    %4 = vector.load %arg3[%c0_2, %c0_3] : memref<2x128xf32, #tpu.memory_space<vmem>>, vector<2x128xf32>
    %c0_4 = arith.constant 0 : index
    %c0_5 = arith.constant 0 : index
    %5 = vector.load %arg4[%c0_4, %c0_5] : memref<2x128xf32, #tpu.memory_space<vmem>>, vector<2x128xf32>
    %cst = arith.constant 0.000000e+00 : f32
    %6 = vector.broadcast %cst : f32 to vector<2x128xf32>
    %7 = arith.cmpf oeq, %4, %6 : vector<2x128xf32>
    %cst_6 = arith.constant 2.000000e-03 : f32
    %8 = vector.broadcast %cst_6 : f32 to vector<2x128xf32>
    %9 = arith.select %7, %8, %4 : vector<2x128xi1>, vector<2x128xf32>
    %10 = arith.mulf %9, %5 : vector<2x128xf32>
    %cst_7 = arith.constant 2.000000e-03 : f32
    %11 = vector.broadcast %cst_7 : f32 to vector<2x128xf32>
    %12 = arith.subf %4, %11 : vector<2x128xf32>
    %cst_8 = arith.constant 0.000000e+00 : f32
    %13 = vector.broadcast %cst_8 : f32 to vector<2x128xf32>
    %14 = arith.maximumf %12, %13 : vector<2x128xf32>
    %cst_9 = arith.constant 1.000000e-03 : f32
    %15 = vector.broadcast %cst_9 : f32 to vector<2x128xf32>
    %16 = arith.addf %14, %15 : vector<2x128xf32>
    %cst_10 = arith.constant 0.000000e+00 : f32
    %17 = vector.broadcast %cst_10 : f32 to vector<2x128xf32>
    %18 = arith.subf %17, %3 : vector<2x128xf32>
    %19 = math.exp %18 : vector<2x128xf32>
    %cst_11 = arith.constant 1.000000e+00 : f32
    %20 = vector.broadcast %cst_11 : f32 to vector<2x128xf32>
    %21 = arith.addf %20, %19 : vector<2x128xf32>
    %cst_12 = arith.constant 1.000000e+00 : f32
    %22 = vector.broadcast %cst_12 : f32 to vector<2x128xf32>
    %23 = arith.divf %22, %21 : vector<2x128xf32>
    %cst_13 = arith.constant 9.99999993E-9 : f32
    %24 = vector.broadcast %cst_13 : f32 to vector<2x128xf32>
    %25 = arith.maximumf %23, %24 : vector<2x128xf32>
    %cst_14 = arith.constant 1.000000e+00 : f32
    %26 = vector.broadcast %cst_14 : f32 to vector<2x128xf32>
    %27 = arith.subf %26, %25 : vector<2x128xf32>
    %28 = arith.mulf %27, %27 : vector<2x128xf32>
    %29 = arith.mulf %16, %16 : vector<2x128xf32>
    %30 = arith.mulf %29, %29 : vector<2x128xf32>
    %31 = arith.mulf %28, %30 : vector<2x128xf32>
    %32 = math.log %25 : vector<2x128xf32>
    %33 = arith.mulf %31, %32 : vector<2x128xf32>
    %34 = arith.mulf %25, %25 : vector<2x128xf32>
    %cst_15 = arith.constant 1.000000e+00 : f32
    %35 = vector.broadcast %cst_15 : f32 to vector<2x128xf32>
    %36 = arith.subf %35, %16 : vector<2x128xf32>
    %37 = arith.mulf %36, %36 : vector<2x128xf32>
    %38 = arith.mulf %37, %37 : vector<2x128xf32>
    %39 = arith.mulf %34, %38 : vector<2x128xf32>
    %cst_16 = arith.constant 1.000000e+00 : f32
    %40 = vector.broadcast %cst_16 : f32 to vector<2x128xf32>
    %41 = arith.subf %40, %25 : vector<2x128xf32>
    %cst_17 = arith.constant 9.99999993E-9 : f32
    %42 = vector.broadcast %cst_17 : f32 to vector<2x128xf32>
    %43 = arith.maximumf %41, %42 : vector<2x128xf32>
    %44 = math.log %43 : vector<2x128xf32>
    %45 = arith.mulf %39, %44 : vector<2x128xf32>
    %46 = arith.addf %33, %45 : vector<2x128xf32>
    %47 = arith.mulf %9, %46 : vector<2x128xf32>
    %cst_18 = arith.constant 0.000000e+00 : f32
    %48 = vector.broadcast %cst_18 : f32 to vector<2x128xf32>
    %49 = arith.subf %48, %47 : vector<2x128xf32>
    %50 = arith.mulf %49, %5 : vector<2x128xf32>
    %cst_19 = arith.constant 0.000000e+00 : f32
    %51 = vector.broadcast %cst_19 : f32 to vector<2x128xf32>
    %c0_20 = arith.constant 0 : index
    %c0_21 = arith.constant 0 : index
    %c0_22 = arith.constant 0 : index
    %52 = vector.load %arg5[%c0_20, %c0_21, %c0_22] : memref<2x18x128xf32, #tpu.memory_space<vmem>>, vector<2x1x128xf32>
    %53 = vector.shape_cast %52 : vector<2x1x128xf32> to vector<2x128xf32>
    %c0_23 = arith.constant 0 : index
    %c0_24 = arith.constant 0 : index
    %c0_25 = arith.constant 0 : index
    %54 = vector.load %arg6[%c0_23, %c0_24, %c0_25] : memref<2x18x128xf32, #tpu.memory_space<vmem>>, vector<2x1x128xf32>
    %55 = vector.shape_cast %54 : vector<2x1x128xf32> to vector<2x128xf32>
    %cst_26 = arith.constant 0.000000e+00 : f32
    %56 = vector.broadcast %cst_26 : f32 to vector<2x128xf32>
    %57 = arith.subf %56, %53 : vector<2x128xf32>
    %58 = math.exp %57 : vector<2x128xf32>
    %cst_27 = arith.constant 1.000000e+00 : f32
    %59 = vector.broadcast %cst_27 : f32 to vector<2x128xf32>
    %60 = arith.addf %59, %58 : vector<2x128xf32>
    %cst_28 = arith.constant 1.000000e+00 : f32
    %61 = vector.broadcast %cst_28 : f32 to vector<2x128xf32>
    %62 = arith.divf %61, %60 : vector<2x128xf32>
    %cst_29 = arith.constant 9.99999993E-9 : f32
    %63 = vector.broadcast %cst_29 : f32 to vector<2x128xf32>
    %64 = arith.maximumf %62, %63 : vector<2x128xf32>
    %65 = math.log %64 : vector<2x128xf32>
    %66 = arith.mulf %65, %55 : vector<2x128xf32>
    %cst_30 = arith.constant 1.000000e+00 : f32
    %67 = vector.broadcast %cst_30 : f32 to vector<2x128xf32>
    %68 = arith.subf %67, %62 : vector<2x128xf32>
    %cst_31 = arith.constant 9.99999993E-9 : f32
    %69 = vector.broadcast %cst_31 : f32 to vector<2x128xf32>
    %70 = arith.maximumf %68, %69 : vector<2x128xf32>
    %71 = math.log %70 : vector<2x128xf32>
    %cst_32 = arith.constant 1.000000e+00 : f32
    %72 = vector.broadcast %cst_32 : f32 to vector<2x128xf32>
    %73 = arith.subf %72, %55 : vector<2x128xf32>
    %74 = arith.mulf %71, %73 : vector<2x128xf32>
    %75 = arith.addf %66, %74 : vector<2x128xf32>
    %76 = arith.subf %51, %75 : vector<2x128xf32>
    %c0_33 = arith.constant 0 : index
    %c3 = arith.constant 3 : index
    %c0_34 = arith.constant 0 : index
    %77 = vector.load %arg5[%c0_33, %c3, %c0_34] : memref<2x18x128xf32, #tpu.memory_space<vmem>>, vector<2x1x128xf32>
    %78 = vector.shape_cast %77 : vector<2x1x128xf32> to vector<2x128xf32>
    %c0_35 = arith.constant 0 : index
    %c3_36 = arith.constant 3 : index
    %c0_37 = arith.constant 0 : index
    %79 = vector.load %arg6[%c0_35, %c3_36, %c0_37] : memref<2x18x128xf32, #tpu.memory_space<vmem>>, vector<2x1x128xf32>
    %80 = vector.shape_cast %79 : vector<2x1x128xf32> to vector<2x128xf32>
    %cst_38 = arith.constant 0.000000e+00 : f32
    %81 = vector.broadcast %cst_38 : f32 to vector<2x128xf32>
    %82 = arith.subf %81, %78 : vector<2x128xf32>
    %83 = math.exp %82 : vector<2x128xf32>
    %cst_39 = arith.constant 1.000000e+00 : f32
    %84 = vector.broadcast %cst_39 : f32 to vector<2x128xf32>
    %85 = arith.addf %84, %83 : vector<2x128xf32>
    %cst_40 = arith.constant 1.000000e+00 : f32
    %86 = vector.broadcast %cst_40 : f32 to vector<2x128xf32>
    %87 = arith.divf %86, %85 : vector<2x128xf32>
    %cst_41 = arith.constant 9.99999993E-9 : f32
    %88 = vector.broadcast %cst_41 : f32 to vector<2x128xf32>
    %89 = arith.maximumf %87, %88 : vector<2x128xf32>
    %90 = math.log %89 : vector<2x128xf32>
    %91 = arith.mulf %90, %80 : vector<2x128xf32>
    %cst_42 = arith.constant 1.000000e+00 : f32
    %92 = vector.broadcast %cst_42 : f32 to vector<2x128xf32>
    %93 = arith.subf %92, %87 : vector<2x128xf32>
    %cst_43 = arith.constant 9.99999993E-9 : f32
    %94 = vector.broadcast %cst_43 : f32 to vector<2x128xf32>
    %95 = arith.maximumf %93, %94 : vector<2x128xf32>
    %96 = math.log %95 : vector<2x128xf32>
    %cst_44 = arith.constant 1.000000e+00 : f32
    %97 = vector.broadcast %cst_44 : f32 to vector<2x128xf32>
    %98 = arith.subf %97, %80 : vector<2x128xf32>
    %99 = arith.mulf %96, %98 : vector<2x128xf32>
    %100 = arith.addf %91, %99 : vector<2x128xf32>
    %101 = arith.subf %76, %100 : vector<2x128xf32>
    %c0_45 = arith.constant 0 : index
    %c6 = arith.constant 6 : index
    %c0_46 = arith.constant 0 : index
    %102 = vector.load %arg5[%c0_45, %c6, %c0_46] : memref<2x18x128xf32, #tpu.memory_space<vmem>>, vector<2x1x128xf32>
    %103 = vector.shape_cast %102 : vector<2x1x128xf32> to vector<2x128xf32>
    %c0_47 = arith.constant 0 : index
    %c6_48 = arith.constant 6 : index
    %c0_49 = arith.constant 0 : index
    %104 = vector.load %arg6[%c0_47, %c6_48, %c0_49] : memref<2x18x128xf32, #tpu.memory_space<vmem>>, vector<2x1x128xf32>
    %105 = vector.shape_cast %104 : vector<2x1x128xf32> to vector<2x128xf32>
    %cst_50 = arith.constant 0.000000e+00 : f32
    %106 = vector.broadcast %cst_50 : f32 to vector<2x128xf32>
    %107 = arith.subf %106, %103 : vector<2x128xf32>
    %108 = math.exp %107 : vector<2x128xf32>
    %cst_51 = arith.constant 1.000000e+00 : f32
    %109 = vector.broadcast %cst_51 : f32 to vector<2x128xf32>
    %110 = arith.addf %109, %108 : vector<2x128xf32>
    %cst_52 = arith.constant 1.000000e+00 : f32
    %111 = vector.broadcast %cst_52 : f32 to vector<2x128xf32>
    %112 = arith.divf %111, %110 : vector<2x128xf32>
    %cst_53 = arith.constant 9.99999993E-9 : f32
    %113 = vector.broadcast %cst_53 : f32 to vector<2x128xf32>
    %114 = arith.maximumf %112, %113 : vector<2x128xf32>
    %115 = math.log %114 : vector<2x128xf32>
    %116 = arith.mulf %115, %105 : vector<2x128xf32>
    %cst_54 = arith.constant 1.000000e+00 : f32
    %117 = vector.broadcast %cst_54 : f32 to vector<2x128xf32>
    %118 = arith.subf %117, %112 : vector<2x128xf32>
    %cst_55 = arith.constant 9.99999993E-9 : f32
    %119 = vector.broadcast %cst_55 : f32 to vector<2x128xf32>
    %120 = arith.maximumf %118, %119 : vector<2x128xf32>
    %121 = math.log %120 : vector<2x128xf32>
    %cst_56 = arith.constant 1.000000e+00 : f32
    %122 = vector.broadcast %cst_56 : f32 to vector<2x128xf32>
    %123 = arith.subf %122, %105 : vector<2x128xf32>
    %124 = arith.mulf %121, %123 : vector<2x128xf32>
    %125 = arith.addf %116, %124 : vector<2x128xf32>
    %126 = arith.subf %101, %125 : vector<2x128xf32>
    %c0_57 = arith.constant 0 : index
    %c9 = arith.constant 9 : index
    %c0_58 = arith.constant 0 : index
    %127 = vector.load %arg5[%c0_57, %c9, %c0_58] : memref<2x18x128xf32, #tpu.memory_space<vmem>>, vector<2x1x128xf32>
    %128 = vector.shape_cast %127 : vector<2x1x128xf32> to vector<2x128xf32>
    %c0_59 = arith.constant 0 : index
    %c9_60 = arith.constant 9 : index
    %c0_61 = arith.constant 0 : index
    %129 = vector.load %arg6[%c0_59, %c9_60, %c0_61] : memref<2x18x128xf32, #tpu.memory_space<vmem>>, vector<2x1x128xf32>
    %130 = vector.shape_cast %129 : vector<2x1x128xf32> to vector<2x128xf32>
    %cst_62 = arith.constant 0.000000e+00 : f32
    %131 = vector.broadcast %cst_62 : f32 to vector<2x128xf32>
    %132 = arith.subf %131, %128 : vector<2x128xf32>
    %133 = math.exp %132 : vector<2x128xf32>
    %cst_63 = arith.constant 1.000000e+00 : f32
    %134 = vector.broadcast %cst_63 : f32 to vector<2x128xf32>
    %135 = arith.addf %134, %133 : vector<2x128xf32>
    %cst_64 = arith.constant 1.000000e+00 : f32
    %136 = vector.broadcast %cst_64 : f32 to vector<2x128xf32>
    %137 = arith.divf %136, %135 : vector<2x128xf32>
    %cst_65 = arith.constant 9.99999993E-9 : f32
    %138 = vector.broadcast %cst_65 : f32 to vector<2x128xf32>
    %139 = arith.maximumf %137, %138 : vector<2x128xf32>
    %140 = math.log %139 : vector<2x128xf32>
    %141 = arith.mulf %140, %130 : vector<2x128xf32>
    %cst_66 = arith.constant 1.000000e+00 : f32
    %142 = vector.broadcast %cst_66 : f32 to vector<2x128xf32>
    %143 = arith.subf %142, %137 : vector<2x128xf32>
    %cst_67 = arith.constant 9.99999993E-9 : f32
    %144 = vector.broadcast %cst_67 : f32 to vector<2x128xf32>
    %145 = arith.maximumf %143, %144 : vector<2x128xf32>
    %146 = math.log %145 : vector<2x128xf32>
    %cst_68 = arith.constant 1.000000e+00 : f32
    %147 = vector.broadcast %cst_68 : f32 to vector<2x128xf32>
    %148 = arith.subf %147, %130 : vector<2x128xf32>
    %149 = arith.mulf %146, %148 : vector<2x128xf32>
    %150 = arith.addf %141, %149 : vector<2x128xf32>
    %151 = arith.subf %126, %150 : vector<2x128xf32>
    %c0_69 = arith.constant 0 : index
    %c12 = arith.constant 12 : index
    %c0_70 = arith.constant 0 : index
    %152 = vector.load %arg5[%c0_69, %c12, %c0_70] : memref<2x18x128xf32, #tpu.memory_space<vmem>>, vector<2x1x128xf32>
    %153 = vector.shape_cast %152 : vector<2x1x128xf32> to vector<2x128xf32>
    %c0_71 = arith.constant 0 : index
    %c12_72 = arith.constant 12 : index
    %c0_73 = arith.constant 0 : index
    %154 = vector.load %arg6[%c0_71, %c12_72, %c0_73] : memref<2x18x128xf32, #tpu.memory_space<vmem>>, vector<2x1x128xf32>
    %155 = vector.shape_cast %154 : vector<2x1x128xf32> to vector<2x128xf32>
    %cst_74 = arith.constant 0.000000e+00 : f32
    %156 = vector.broadcast %cst_74 : f32 to vector<2x128xf32>
    %157 = arith.subf %156, %153 : vector<2x128xf32>
    %158 = math.exp %157 : vector<2x128xf32>
    %cst_75 = arith.constant 1.000000e+00 : f32
    %159 = vector.broadcast %cst_75 : f32 to vector<2x128xf32>
    %160 = arith.addf %159, %158 : vector<2x128xf32>
    %cst_76 = arith.constant 1.000000e+00 : f32
    %161 = vector.broadcast %cst_76 : f32 to vector<2x128xf32>
    %162 = arith.divf %161, %160 : vector<2x128xf32>
    %cst_77 = arith.constant 9.99999993E-9 : f32
    %163 = vector.broadcast %cst_77 : f32 to vector<2x128xf32>
    %164 = arith.maximumf %162, %163 : vector<2x128xf32>
    %165 = math.log %164 : vector<2x128xf32>
    %166 = arith.mulf %165, %155 : vector<2x128xf32>
    %cst_78 = arith.constant 1.000000e+00 : f32
    %167 = vector.broadcast %cst_78 : f32 to vector<2x128xf32>
    %168 = arith.subf %167, %162 : vector<2x128xf32>
    %cst_79 = arith.constant 9.99999993E-9 : f32
    %169 = vector.broadcast %cst_79 : f32 to vector<2x128xf32>
    %170 = arith.maximumf %168, %169 : vector<2x128xf32>
    %171 = math.log %170 : vector<2x128xf32>
    %cst_80 = arith.constant 1.000000e+00 : f32
    %172 = vector.broadcast %cst_80 : f32 to vector<2x128xf32>
    %173 = arith.subf %172, %155 : vector<2x128xf32>
    %174 = arith.mulf %171, %173 : vector<2x128xf32>
    %175 = arith.addf %166, %174 : vector<2x128xf32>
    %176 = arith.subf %151, %175 : vector<2x128xf32>
    %c0_81 = arith.constant 0 : index
    %c15 = arith.constant 15 : index
    %c0_82 = arith.constant 0 : index
    %177 = vector.load %arg5[%c0_81, %c15, %c0_82] : memref<2x18x128xf32, #tpu.memory_space<vmem>>, vector<2x1x128xf32>
    %178 = vector.shape_cast %177 : vector<2x1x128xf32> to vector<2x128xf32>
    %c0_83 = arith.constant 0 : index
    %c15_84 = arith.constant 15 : index
    %c0_85 = arith.constant 0 : index
    %179 = vector.load %arg6[%c0_83, %c15_84, %c0_85] : memref<2x18x128xf32, #tpu.memory_space<vmem>>, vector<2x1x128xf32>
    %180 = vector.shape_cast %179 : vector<2x1x128xf32> to vector<2x128xf32>
    %cst_86 = arith.constant 0.000000e+00 : f32
    %181 = vector.broadcast %cst_86 : f32 to vector<2x128xf32>
    %182 = arith.subf %181, %178 : vector<2x128xf32>
    %183 = math.exp %182 : vector<2x128xf32>
    %cst_87 = arith.constant 1.000000e+00 : f32
    %184 = vector.broadcast %cst_87 : f32 to vector<2x128xf32>
    %185 = arith.addf %184, %183 : vector<2x128xf32>
    %cst_88 = arith.constant 1.000000e+00 : f32
    %186 = vector.broadcast %cst_88 : f32 to vector<2x128xf32>
    %187 = arith.divf %186, %185 : vector<2x128xf32>
    %cst_89 = arith.constant 9.99999993E-9 : f32
    %188 = vector.broadcast %cst_89 : f32 to vector<2x128xf32>
    %189 = arith.maximumf %187, %188 : vector<2x128xf32>
    %190 = math.log %189 : vector<2x128xf32>
    %191 = arith.mulf %190, %180 : vector<2x128xf32>
    %cst_90 = arith.constant 1.000000e+00 : f32
    %192 = vector.broadcast %cst_90 : f32 to vector<2x128xf32>
    %193 = arith.subf %192, %187 : vector<2x128xf32>
    %cst_91 = arith.constant 9.99999993E-9 : f32
    %194 = vector.broadcast %cst_91 : f32 to vector<2x128xf32>
    %195 = arith.maximumf %193, %194 : vector<2x128xf32>
    %196 = math.log %195 : vector<2x128xf32>
    %cst_92 = arith.constant 1.000000e+00 : f32
    %197 = vector.broadcast %cst_92 : f32 to vector<2x128xf32>
    %198 = arith.subf %197, %180 : vector<2x128xf32>
    %199 = arith.mulf %196, %198 : vector<2x128xf32>
    %200 = arith.addf %191, %199 : vector<2x128xf32>
    %201 = arith.subf %176, %200 : vector<2x128xf32>
    %202 = arith.mulf %201, %10 : vector<2x128xf32>
    %cst_93 = arith.constant 0.000000e+00 : f32
    %203 = vector.broadcast %cst_93 : f32 to vector<2x128xf32>
    %c0_94 = arith.constant 0 : index
    %c1 = arith.constant 1 : index
    %c0_95 = arith.constant 0 : index
    %204 = vector.load %arg5[%c0_94, %c1, %c0_95] : memref<2x18x128xf32, #tpu.memory_space<vmem>>, vector<2x1x128xf32>
    %205 = vector.shape_cast %204 : vector<2x1x128xf32> to vector<2x128xf32>
    %c0_96 = arith.constant 0 : index
    %c1_97 = arith.constant 1 : index
    %c0_98 = arith.constant 0 : index
    %206 = vector.load %arg6[%c0_96, %c1_97, %c0_98] : memref<2x18x128xf32, #tpu.memory_space<vmem>>, vector<2x1x128xf32>
    %207 = vector.shape_cast %206 : vector<2x1x128xf32> to vector<2x128xf32>
    %208 = arith.subf %205, %207 : vector<2x128xf32>
    %209 = arith.mulf %208, %208 : vector<2x128xf32>
    %210 = arith.addf %203, %209 : vector<2x128xf32>
    %c0_99 = arith.constant 0 : index
    %c2 = arith.constant 2 : index
    %c0_100 = arith.constant 0 : index
    %211 = vector.load %arg5[%c0_99, %c2, %c0_100] : memref<2x18x128xf32, #tpu.memory_space<vmem>>, vector<2x1x128xf32>
    %212 = vector.shape_cast %211 : vector<2x1x128xf32> to vector<2x128xf32>
    %c0_101 = arith.constant 0 : index
    %c2_102 = arith.constant 2 : index
    %c0_103 = arith.constant 0 : index
    %213 = vector.load %arg6[%c0_101, %c2_102, %c0_103] : memref<2x18x128xf32, #tpu.memory_space<vmem>>, vector<2x1x128xf32>
    %214 = vector.shape_cast %213 : vector<2x1x128xf32> to vector<2x128xf32>
    %215 = arith.subf %212, %214 : vector<2x128xf32>
    %216 = arith.mulf %215, %215 : vector<2x128xf32>
    %217 = arith.addf %210, %216 : vector<2x128xf32>
    %c0_104 = arith.constant 0 : index
    %c4 = arith.constant 4 : index
    %c0_105 = arith.constant 0 : index
    %218 = vector.load %arg5[%c0_104, %c4, %c0_105] : memref<2x18x128xf32, #tpu.memory_space<vmem>>, vector<2x1x128xf32>
    %219 = vector.shape_cast %218 : vector<2x1x128xf32> to vector<2x128xf32>
    %c0_106 = arith.constant 0 : index
    %c4_107 = arith.constant 4 : index
    %c0_108 = arith.constant 0 : index
    %220 = vector.load %arg6[%c0_106, %c4_107, %c0_108] : memref<2x18x128xf32, #tpu.memory_space<vmem>>, vector<2x1x128xf32>
    %221 = vector.shape_cast %220 : vector<2x1x128xf32> to vector<2x128xf32>
    %222 = arith.subf %219, %221 : vector<2x128xf32>
    %223 = arith.mulf %222, %222 : vector<2x128xf32>
    %224 = arith.addf %217, %223 : vector<2x128xf32>
    %c0_109 = arith.constant 0 : index
    %c5 = arith.constant 5 : index
    %c0_110 = arith.constant 0 : index
    %225 = vector.load %arg5[%c0_109, %c5, %c0_110] : memref<2x18x128xf32, #tpu.memory_space<vmem>>, vector<2x1x128xf32>
    %226 = vector.shape_cast %225 : vector<2x1x128xf32> to vector<2x128xf32>
    %c0_111 = arith.constant 0 : index
    %c5_112 = arith.constant 5 : index
    %c0_113 = arith.constant 0 : index
    %227 = vector.load %arg6[%c0_111, %c5_112, %c0_113] : memref<2x18x128xf32, #tpu.memory_space<vmem>>, vector<2x1x128xf32>
    %228 = vector.shape_cast %227 : vector<2x1x128xf32> to vector<2x128xf32>
    %229 = arith.subf %226, %228 : vector<2x128xf32>
    %230 = arith.mulf %229, %229 : vector<2x128xf32>
    %231 = arith.addf %224, %230 : vector<2x128xf32>
    %c0_114 = arith.constant 0 : index
    %c7 = arith.constant 7 : index
    %c0_115 = arith.constant 0 : index
    %232 = vector.load %arg5[%c0_114, %c7, %c0_115] : memref<2x18x128xf32, #tpu.memory_space<vmem>>, vector<2x1x128xf32>
    %233 = vector.shape_cast %232 : vector<2x1x128xf32> to vector<2x128xf32>
    %c0_116 = arith.constant 0 : index
    %c7_117 = arith.constant 7 : index
    %c0_118 = arith.constant 0 : index
    %234 = vector.load %arg6[%c0_116, %c7_117, %c0_118] : memref<2x18x128xf32, #tpu.memory_space<vmem>>, vector<2x1x128xf32>
    %235 = vector.shape_cast %234 : vector<2x1x128xf32> to vector<2x128xf32>
    %236 = arith.subf %233, %235 : vector<2x128xf32>
    %237 = arith.mulf %236, %236 : vector<2x128xf32>
    %238 = arith.addf %231, %237 : vector<2x128xf32>
    %c0_119 = arith.constant 0 : index
    %c8 = arith.constant 8 : index
    %c0_120 = arith.constant 0 : index
    %239 = vector.load %arg5[%c0_119, %c8, %c0_120] : memref<2x18x128xf32, #tpu.memory_space<vmem>>, vector<2x1x128xf32>
    %240 = vector.shape_cast %239 : vector<2x1x128xf32> to vector<2x128xf32>
    %c0_121 = arith.constant 0 : index
    %c8_122 = arith.constant 8 : index
    %c0_123 = arith.constant 0 : index
    %241 = vector.load %arg6[%c0_121, %c8_122, %c0_123] : memref<2x18x128xf32, #tpu.memory_space<vmem>>, vector<2x1x128xf32>
    %242 = vector.shape_cast %241 : vector<2x1x128xf32> to vector<2x128xf32>
    %243 = arith.subf %240, %242 : vector<2x128xf32>
    %244 = arith.mulf %243, %243 : vector<2x128xf32>
    %245 = arith.addf %238, %244 : vector<2x128xf32>
    %c0_124 = arith.constant 0 : index
    %c10 = arith.constant 10 : index
    %c0_125 = arith.constant 0 : index
    %246 = vector.load %arg5[%c0_124, %c10, %c0_125] : memref<2x18x128xf32, #tpu.memory_space<vmem>>, vector<2x1x128xf32>
    %247 = vector.shape_cast %246 : vector<2x1x128xf32> to vector<2x128xf32>
    %c0_126 = arith.constant 0 : index
    %c10_127 = arith.constant 10 : index
    %c0_128 = arith.constant 0 : index
    %248 = vector.load %arg6[%c0_126, %c10_127, %c0_128] : memref<2x18x128xf32, #tpu.memory_space<vmem>>, vector<2x1x128xf32>
    %249 = vector.shape_cast %248 : vector<2x1x128xf32> to vector<2x128xf32>
    %250 = arith.subf %247, %249 : vector<2x128xf32>
    %251 = arith.mulf %250, %250 : vector<2x128xf32>
    %252 = arith.addf %245, %251 : vector<2x128xf32>
    %c0_129 = arith.constant 0 : index
    %c11 = arith.constant 11 : index
    %c0_130 = arith.constant 0 : index
    %253 = vector.load %arg5[%c0_129, %c11, %c0_130] : memref<2x18x128xf32, #tpu.memory_space<vmem>>, vector<2x1x128xf32>
    %254 = vector.shape_cast %253 : vector<2x1x128xf32> to vector<2x128xf32>
    %c0_131 = arith.constant 0 : index
    %c11_132 = arith.constant 11 : index
    %c0_133 = arith.constant 0 : index
    %255 = vector.load %arg6[%c0_131, %c11_132, %c0_133] : memref<2x18x128xf32, #tpu.memory_space<vmem>>, vector<2x1x128xf32>
    %256 = vector.shape_cast %255 : vector<2x1x128xf32> to vector<2x128xf32>
    %257 = arith.subf %254, %256 : vector<2x128xf32>
    %258 = arith.mulf %257, %257 : vector<2x128xf32>
    %259 = arith.addf %252, %258 : vector<2x128xf32>
    %c0_134 = arith.constant 0 : index
    %c13 = arith.constant 13 : index
    %c0_135 = arith.constant 0 : index
    %260 = vector.load %arg5[%c0_134, %c13, %c0_135] : memref<2x18x128xf32, #tpu.memory_space<vmem>>, vector<2x1x128xf32>
    %261 = vector.shape_cast %260 : vector<2x1x128xf32> to vector<2x128xf32>
    %c0_136 = arith.constant 0 : index
    %c13_137 = arith.constant 13 : index
    %c0_138 = arith.constant 0 : index
    %262 = vector.load %arg6[%c0_136, %c13_137, %c0_138] : memref<2x18x128xf32, #tpu.memory_space<vmem>>, vector<2x1x128xf32>
    %263 = vector.shape_cast %262 : vector<2x1x128xf32> to vector<2x128xf32>
    %264 = arith.subf %261, %263 : vector<2x128xf32>
    %265 = arith.mulf %264, %264 : vector<2x128xf32>
    %266 = arith.addf %259, %265 : vector<2x128xf32>
    %c0_139 = arith.constant 0 : index
    %c14 = arith.constant 14 : index
    %c0_140 = arith.constant 0 : index
    %267 = vector.load %arg5[%c0_139, %c14, %c0_140] : memref<2x18x128xf32, #tpu.memory_space<vmem>>, vector<2x1x128xf32>
    %268 = vector.shape_cast %267 : vector<2x1x128xf32> to vector<2x128xf32>
    %c0_141 = arith.constant 0 : index
    %c14_142 = arith.constant 14 : index
    %c0_143 = arith.constant 0 : index
    %269 = vector.load %arg6[%c0_141, %c14_142, %c0_143] : memref<2x18x128xf32, #tpu.memory_space<vmem>>, vector<2x1x128xf32>
    %270 = vector.shape_cast %269 : vector<2x1x128xf32> to vector<2x128xf32>
    %271 = arith.subf %268, %270 : vector<2x128xf32>
    %272 = arith.mulf %271, %271 : vector<2x128xf32>
    %273 = arith.addf %266, %272 : vector<2x128xf32>
    %c0_144 = arith.constant 0 : index
    %c16 = arith.constant 16 : index
    %c0_145 = arith.constant 0 : index
    %274 = vector.load %arg5[%c0_144, %c16, %c0_145] : memref<2x18x128xf32, #tpu.memory_space<vmem>>, vector<2x1x128xf32>
    %275 = vector.shape_cast %274 : vector<2x1x128xf32> to vector<2x128xf32>
    %c0_146 = arith.constant 0 : index
    %c16_147 = arith.constant 16 : index
    %c0_148 = arith.constant 0 : index
    %276 = vector.load %arg6[%c0_146, %c16_147, %c0_148] : memref<2x18x128xf32, #tpu.memory_space<vmem>>, vector<2x1x128xf32>
    %277 = vector.shape_cast %276 : vector<2x1x128xf32> to vector<2x128xf32>
    %278 = arith.subf %275, %277 : vector<2x128xf32>
    %279 = arith.mulf %278, %278 : vector<2x128xf32>
    %280 = arith.addf %273, %279 : vector<2x128xf32>
    %c0_149 = arith.constant 0 : index
    %c17 = arith.constant 17 : index
    %c0_150 = arith.constant 0 : index
    %281 = vector.load %arg5[%c0_149, %c17, %c0_150] : memref<2x18x128xf32, #tpu.memory_space<vmem>>, vector<2x1x128xf32>
    %282 = vector.shape_cast %281 : vector<2x1x128xf32> to vector<2x128xf32>
    %c0_151 = arith.constant 0 : index
    %c17_152 = arith.constant 17 : index
    %c0_153 = arith.constant 0 : index
    %283 = vector.load %arg6[%c0_151, %c17_152, %c0_153] : memref<2x18x128xf32, #tpu.memory_space<vmem>>, vector<2x1x128xf32>
    %284 = vector.shape_cast %283 : vector<2x1x128xf32> to vector<2x128xf32>
    %285 = arith.subf %282, %284 : vector<2x128xf32>
    %286 = arith.mulf %285, %285 : vector<2x128xf32>
    %287 = arith.addf %280, %286 : vector<2x128xf32>
    %cst_154 = arith.constant dense<0.000000e+00> : vector<128xf32>
    %288 = vector.multi_reduction <add>, %287, %cst_154 [0] : vector<2x128xf32> to vector<128xf32>
    %289 = vector.shape_cast %288 : vector<128xf32> to vector<1x128xf32>
    %290 = arith.mulf %4, %5 : vector<2x128xf32>
    %291 = arith.mulf %290, %5 : vector<2x128xf32>
    %cst_155 = arith.constant dense<0.000000e+00> : vector<128xf32>
    %292 = vector.multi_reduction <add>, %291, %cst_155 [0] : vector<2x128xf32> to vector<128xf32>
    %293 = vector.shape_cast %292 : vector<128xf32> to vector<1x128xf32>
    %c0_156 = arith.constant 0 : index
    %c0_157 = arith.constant 0 : index
    %294 = vector.load %arg8[%c0_156, %c0_157] : memref<1x1xf32, #tpu.memory_space<vmem>>, vector<1x1xf32>
    %295 = vector.shape_cast %10 : vector<2x128xf32> to vector<1x2x128xf32>
    %cst_158 = arith.constant dense<0.000000e+00> : vector<1xf32>
    %296 = vector.multi_reduction <add>, %295, %cst_158 [1, 2] : vector<1x2x128xf32> to vector<1xf32>
    %297 = vector.shape_cast %296 : vector<1xf32> to vector<1x1x1xf32>
    %298 = vector.extract %297[0, 0, 0] : f32 from vector<1x1x1xf32>
    %299 = vector.broadcast %298 : f32 to vector<1x1xf32>
    %300 = arith.addf %294, %299 : vector<1x1xf32>
    %c0_159 = arith.constant 0 : index
    %c0_160 = arith.constant 0 : index
    %301 = vector.load %arg8[%c0_159, %c0_160] : memref<1x1xf32, #tpu.memory_space<vmem>>, vector<1x1xf32>
    tpu.vector_store %arg8[%c0_159, %c0_160], %300 {strides = array<i32>} : memref<1x1xf32, #tpu.memory_space<vmem>>, vector<1x1xf32>,
    %c0_161 = arith.constant 0 : index
    %c0_162 = arith.constant 0 : index
    %302 = vector.load %arg9[%c0_161, %c0_162] : memref<1x1xf32, #tpu.memory_space<vmem>>, vector<1x1xf32>
    %303 = vector.shape_cast %50 : vector<2x128xf32> to vector<1x2x128xf32>
    %cst_163 = arith.constant dense<0.000000e+00> : vector<1xf32>
    %304 = vector.multi_reduction <add>, %303, %cst_163 [1, 2] : vector<1x2x128xf32> to vector<1xf32>
    %305 = vector.shape_cast %304 : vector<1xf32> to vector<1x1x1xf32>
    %306 = vector.extract %305[0, 0, 0] : f32 from vector<1x1x1xf32>
    %307 = vector.broadcast %306 : f32 to vector<1x1xf32>
    %308 = arith.addf %302, %307 : vector<1x1xf32>
    %c0_164 = arith.constant 0 : index
    %c0_165 = arith.constant 0 : index
    %309 = vector.load %arg9[%c0_164, %c0_165] : memref<1x1xf32, #tpu.memory_space<vmem>>, vector<1x1xf32>
    tpu.vector_store %arg9[%c0_164, %c0_165], %308 {strides = array<i32>} : memref<1x1xf32, #tpu.memory_space<vmem>>, vector<1x1xf32>,
    %c0_166 = arith.constant 0 : index
    %c0_167 = arith.constant 0 : index
    %310 = vector.load %arg10[%c0_166, %c0_167] : memref<1x1xf32, #tpu.memory_space<vmem>>, vector<1x1xf32>
    %311 = vector.shape_cast %202 : vector<2x128xf32> to vector<1x2x128xf32>
    %cst_168 = arith.constant dense<0.000000e+00> : vector<1xf32>
    %312 = vector.multi_reduction <add>, %311, %cst_168 [1, 2] : vector<1x2x128xf32> to vector<1xf32>
    %313 = vector.shape_cast %312 : vector<1xf32> to vector<1x1x1xf32>
    %314 = vector.extract %313[0, 0, 0] : f32 from vector<1x1x1xf32>
    %315 = vector.broadcast %314 : f32 to vector<1x1xf32>
    %316 = arith.addf %310, %315 : vector<1x1xf32>
    %c0_169 = arith.constant 0 : index
    %c0_170 = arith.constant 0 : index
    %317 = vector.load %arg10[%c0_169, %c0_170] : memref<1x1xf32, #tpu.memory_space<vmem>>, vector<1x1xf32>
    tpu.vector_store %arg10[%c0_169, %c0_170], %316 {strides = array<i32>} : memref<1x1xf32, #tpu.memory_space<vmem>>, vector<1x1xf32>,
    %c0_171 = arith.constant 0 : index
    %c0_172 = arith.constant 0 : index
    %318 = vector.load %arg11[%c0_171, %c0_172] : memref<1x1xf32, #tpu.memory_space<vmem>>, vector<1x1xf32>
    %319 = arith.mulf %4, %5 : vector<2x128xf32>
    %320 = vector.shape_cast %319 : vector<2x128xf32> to vector<1x2x128xf32>
    %cst_173 = arith.constant dense<0.000000e+00> : vector<1xf32>
    %321 = vector.multi_reduction <add>, %320, %cst_173 [1, 2] : vector<1x2x128xf32> to vector<1xf32>
    %322 = vector.shape_cast %321 : vector<1xf32> to vector<1x1x1xf32>
    %323 = vector.extract %322[0, 0, 0] : f32 from vector<1x1x1xf32>
    %324 = vector.broadcast %323 : f32 to vector<1x1xf32>
    %325 = arith.addf %318, %324 : vector<1x1xf32>
    %c0_174 = arith.constant 0 : index
    %c0_175 = arith.constant 0 : index
    %326 = vector.load %arg11[%c0_174, %c0_175] : memref<1x1xf32, #tpu.memory_space<vmem>>, vector<1x1xf32>
    tpu.vector_store %arg11[%c0_174, %c0_175], %325 {strides = array<i32>} : memref<1x1xf32, #tpu.memory_space<vmem>>, vector<1x1xf32>,
    %c0_176 = arith.constant 0 : index
    %c0_177 = arith.constant 0 : index
    %327 = vector.load %arg12[%c0_176, %c0_177] : memref<1x1xf32, #tpu.memory_space<vmem>>, vector<1x1xf32>
    %328 = arith.mulf %289, %293 : vector<1x128xf32>
    %329 = vector.shape_cast %328 : vector<1x128xf32> to vector<1x1x128xf32>
    %cst_178 = arith.constant dense<0.000000e+00> : vector<1xf32>
    %330 = vector.multi_reduction <add>, %329, %cst_178 [1, 2] : vector<1x1x128xf32> to vector<1xf32>
    %331 = vector.shape_cast %330 : vector<1xf32> to vector<1x1x1xf32>
    %332 = vector.extract %331[0, 0, 0] : f32 from vector<1x1x1xf32>
    %333 = vector.broadcast %332 : f32 to vector<1x1xf32>
    %334 = arith.addf %327, %333 : vector<1x1xf32>
    %c0_179 = arith.constant 0 : index
    %c0_180 = arith.constant 0 : index
    %335 = vector.load %arg12[%c0_179, %c0_180] : memref<1x1xf32, #tpu.memory_space<vmem>>, vector<1x1xf32>
    tpu.vector_store %arg12[%c0_179, %c0_180], %334 {strides = array<i32>} : memref<1x1xf32, #tpu.memory_space<vmem>>, vector<1x1xf32>,
    %c3_i32 = arith.constant 3 : i32
    %336 = arith.cmpi eq, %arg1, %c3_i32 : i32
    %337 = arith.extui %336 : i1 to i32
    %c0_i32_181 = arith.constant 0 : i32
    %338 = arith.cmpi ne, %337, %c0_i32_181 : i32
    scf.if %338 {
      %339 = tpu.iota {dimensions = array<i32: 2>} : vector<1x1x8xi32>
      %c0_i32_182 = arith.constant 0 : i32
      %340 = vector.broadcast %c0_i32_182 : i32 to vector<1x1x8xi32>
      %341 = arith.cmpi eq, %339, %340 : vector<1x1x8xi32>
      %c0_183 = arith.constant 0 : index
      %c0_184 = arith.constant 0 : index
      %342 = vector.load %arg8[%c0_183, %c0_184] : memref<1x1xf32, #tpu.memory_space<vmem>>, vector<1x1xf32>
      %cst_185 = arith.constant 0.000000e+00 : f32
      %343 = vector.shape_cast %342 : vector<1x1xf32> to vector<1x1x1xf32>
      %344 = vector.broadcast %343 : vector<1x1x1xf32> to vector<1x1x8xf32>
      %345 = vector.broadcast %cst_185 : f32 to vector<1x1x8xf32>
      %346 = arith.select %341, %344, %345 : vector<1x1x8xi1>, vector<1x1x8xf32>
      %c1_i32 = arith.constant 1 : i32
      %347 = vector.broadcast %c1_i32 : i32 to vector<1x1x8xi32>
      %348 = arith.cmpi eq, %339, %347 : vector<1x1x8xi32>
      %c0_186 = arith.constant 0 : index
      %c0_187 = arith.constant 0 : index
      %349 = vector.load %arg9[%c0_186, %c0_187] : memref<1x1xf32, #tpu.memory_space<vmem>>, vector<1x1xf32>
      %cst_188 = arith.constant 0.000000e+00 : f32
      %350 = vector.shape_cast %349 : vector<1x1xf32> to vector<1x1x1xf32>
      %351 = vector.broadcast %350 : vector<1x1x1xf32> to vector<1x1x8xf32>
      %352 = vector.broadcast %cst_188 : f32 to vector<1x1x8xf32>
      %353 = arith.select %348, %351, %352 : vector<1x1x8xi1>, vector<1x1x8xf32>
      %354 = arith.addf %346, %353 : vector<1x1x8xf32>
      %c2_i32 = arith.constant 2 : i32
      %355 = vector.broadcast %c2_i32 : i32 to vector<1x1x8xi32>
      %356 = arith.cmpi eq, %339, %355 : vector<1x1x8xi32>
      %c0_189 = arith.constant 0 : index
      %c0_190 = arith.constant 0 : index
      %357 = vector.load %arg10[%c0_189, %c0_190] : memref<1x1xf32, #tpu.memory_space<vmem>>, vector<1x1xf32>
      %cst_191 = arith.constant 0.000000e+00 : f32
      %358 = vector.shape_cast %357 : vector<1x1xf32> to vector<1x1x1xf32>
      %359 = vector.broadcast %358 : vector<1x1x1xf32> to vector<1x1x8xf32>
      %360 = vector.broadcast %cst_191 : f32 to vector<1x1x8xf32>
      %361 = arith.select %356, %359, %360 : vector<1x1x8xi1>, vector<1x1x8xf32>
      %362 = arith.addf %354, %361 : vector<1x1x8xf32>
      %c3_i32_192 = arith.constant 3 : i32
      %363 = vector.broadcast %c3_i32_192 : i32 to vector<1x1x8xi32>
      %364 = arith.cmpi eq, %339, %363 : vector<1x1x8xi32>
      %c0_193 = arith.constant 0 : index
      %c0_194 = arith.constant 0 : index
      %365 = vector.load %arg11[%c0_193, %c0_194] : memref<1x1xf32, #tpu.memory_space<vmem>>, vector<1x1xf32>
      %cst_195 = arith.constant 0.000000e+00 : f32
      %366 = vector.shape_cast %365 : vector<1x1xf32> to vector<1x1x1xf32>
      %367 = vector.broadcast %366 : vector<1x1x1xf32> to vector<1x1x8xf32>
      %368 = vector.broadcast %cst_195 : f32 to vector<1x1x8xf32>
      %369 = arith.select %364, %367, %368 : vector<1x1x8xi1>, vector<1x1x8xf32>
      %370 = arith.addf %362, %369 : vector<1x1x8xf32>
      %c4_i32 = arith.constant 4 : i32
      %371 = vector.broadcast %c4_i32 : i32 to vector<1x1x8xi32>
      %372 = arith.cmpi eq, %339, %371 : vector<1x1x8xi32>
      %c0_196 = arith.constant 0 : index
      %c0_197 = arith.constant 0 : index
      %373 = vector.load %arg12[%c0_196, %c0_197] : memref<1x1xf32, #tpu.memory_space<vmem>>, vector<1x1xf32>
      %cst_198 = arith.constant 0.000000e+00 : f32
      %374 = vector.shape_cast %373 : vector<1x1xf32> to vector<1x1x1xf32>
      %375 = vector.broadcast %374 : vector<1x1x1xf32> to vector<1x1x8xf32>
      %376 = vector.broadcast %cst_198 : f32 to vector<1x1x8xf32>
      %377 = arith.select %372, %375, %376 : vector<1x1x8xi1>, vector<1x1x8xf32>
      %378 = arith.addf %370, %377 : vector<1x1x8xf32>
      %c0_199 = arith.constant 0 : index
      %c0_200 = arith.constant 0 : index
      %c0_201 = arith.constant 0 : index
      %379 = vector.load %arg7[%c0_199, %c0_200, %c0_201] : memref<1x1x8xf32, #tpu.memory_space<vmem>>, vector<1x1x8xf32>
      tpu.vector_store %arg7[%c0_199, %c0_200, %c0_201], %378 {strides = array<i32>} : memref<1x1x8xf32, #tpu.memory_space<vmem>>, vector<1x1x8xf32>,
    } else {
    }
    return
  }
  func.func @transform_0(%arg0: i32, %arg1: i32) -> (i32, i32) {
    %c4_i32 = arith.constant 4 : i32
    %0 = arith.muli %arg0, %c4_i32 : i32
    %1 = arith.addi %0, %arg1 : i32
    %c0_i32 = arith.constant 0 : i32
    %c0_i32_0 = arith.constant 0 : i32
    return %c0_i32, %1 : i32, i32
  }
  func.func @transform_1(%arg0: i32, %arg1: i32) -> (i32, i32) {
    %c4_i32 = arith.constant 4 : i32
    %0 = arith.muli %arg0, %c4_i32 : i32
    %1 = arith.addi %0, %arg1 : i32
    %c0_i32 = arith.constant 0 : i32
    %c0_i32_0 = arith.constant 0 : i32
    return %c0_i32, %1 : i32, i32
  }
  func.func @transform_2(%arg0: i32, %arg1: i32) -> (i32, i32) {
    %c4_i32 = arith.constant 4 : i32
    %0 = arith.muli %arg0, %c4_i32 : i32
    %1 = arith.addi %0, %arg1 : i32
    %c0_i32 = arith.constant 0 : i32
    %c0_i32_0 = arith.constant 0 : i32
    return %c0_i32, %1 : i32, i32
  }
  func.func @transform_3(%arg0: i32, %arg1: i32) -> (i32, i32, i32) {
    %c4_i32 = arith.constant 4 : i32
    %0 = arith.muli %arg0, %c4_i32 : i32
    %1 = arith.addi %0, %arg1 : i32
    %c0_i32 = arith.constant 0 : i32
    %c0_i32_0 = arith.constant 0 : i32
    %c0_i32_1 = arith.constant 0 : i32
    return %c0_i32, %c0_i32_0, %1 : i32, i32, i32
  }
  func.func @transform_4(%arg0: i32, %arg1: i32) -> (i32, i32, i32) {
    %c4_i32 = arith.constant 4 : i32
    %0 = arith.muli %arg0, %c4_i32 : i32
    %1 = arith.addi %0, %arg1 : i32
    %c0_i32 = arith.constant 0 : i32
    %c0_i32_0 = arith.constant 0 : i32
    %c0_i32_1 = arith.constant 0 : i32
    return %c0_i32, %c0_i32_0, %1 : i32, i32, i32
  }
  func.func @transform_5(%arg0: i32, %arg1: i32) -> (i32, i32, i32) {
    %c0_i32 = arith.constant 0 : i32
    %c0_i32_0 = arith.constant 0 : i32
    %c0_i32_1 = arith.constant 0 : i32
    return %arg0, %c0_i32, %c0_i32_0 : i32, i32, i32
  }
}

</mosaic_0001>

<bundles_post_ra>
// kernel: tpu_custom_call.1
= control target key start
LH: loop header
LB: loop body
LE: loop exit
PB: predicated region body
PF: predicated region fallthrough
CT: control target
= control target key end

     0   :  { %s1883_s0 = inlined_call_operand.vmem [shape: f32[2,1024], index: 0, kind: input, shape index: {}]   ;;  %s1884_s1 = inlined_call_operand.vmem [shape: f32[2,1024], index: 1, kind: input, shape index: {}]   ;;  %s1885_s2 = inlined_call_operand.vmem [shape: f32[2,1024], index: 2, kind: input, shape index: {}]   ;;  %s1886_s3 = inlined_call_operand.vmem [shape: f32[2,18,1024], index: 3, kind: input, shape index: {}]   ;;  %s1887_s4 = inlined_call_operand.vmem [shape: f32[2,18,1024], index: 4, kind: input, shape index: {}]   ;;  %s1888_s5 = inlined_call_operand.hbm [shape: f32[2,1,8], index: 5, kind: output, shape index: {}]  }
   0x1   :  { %1893 = sst [smem:[#allocation16_spill]] %s1886_s3 }
   0x2   :  { %1894 = sst [smem:[#allocation17_spill]] %s1887_s4 }
   0x3   :  { %10 = vsyncpa [#allocation10], 0 }
   0x4   :  { %12 = vsyncpa [#allocation10 + $0x1], 0  ;;  %s1584_s18 = smov 0   ;;  %s1586_s19 = smov 0  }
   0x5   :  { %s1588_s20 = smov 0   ;;  %s1590_s21 = smov 0  }
   0x6   :  { %s1592_s22 = smov 0   ;;  %s1594_s23 = smov 0  }
   0x7   :  { %s1596_s24 = smov 0   ;;  %s1598_s25 = smov 0  }
   0x8   :  { %s1600_s26 = smov 0   ;;  %s1602_s27 = smov 0  }
   0x9 LB: > { %1895 = sst [smem:[#allocation12_spill]] %s1541_s25  ;;  %s1202_s28 = sadd.s32 4294967295, %s1549_s27   ;;  %s1549_s27 = sphi %s1602_s27, %s18_s27   ;;  %s1545_s26 = sphi %s1600_s26, %s1907_s26   ;;  %s1541_s25 = sphi %s1598_s25, %s1906_s25   ;;  %s1537_s24 = sphi %s1596_s24, %s1905_s24   ;;  %s1533_s23 = sphi %s1594_s23, %s1904_s23   ;;  %s1529_s22 = sphi %s1592_s22, %s1912_s22   ;;  %s1525_s21 = sphi %s1590_s21, %s1911_s21   ;;  %s1521_s20 = sphi %s1588_s20, %s1910_s20   ;;  %s1517_s19 = sphi %s1586_s19, %s1909_s19   ;;  %s1513_s18 = sphi %s1584_s18, %s1908_s18  }
   0xa   : > { %1896 = sst [smem:[#allocation13_spill]] %s1545_s26  ;;  %s1203_s29 = sadd.s32 4294967294, %s1549_s27  }
   0xb   : > { %s27_s30 = sadd.s32 1, %s1541_s25  ;;  %s30_s6 = sadd.s32 1, %s1545_s26 }
   0xc   : > { %p28_p0 = scmp.ge.s32.totalorder %s27_s30, 4  ;;  %s1210_s7 = sshll.u32 %s1545_s26, 2 }
   0xd   : > { %s1640_s8 = sadd.s32 %s1541_s25, %s1210_s7  ;;  %s131_s9 = sadd.s32 1, %s1529_s22 }
   0xe   : > { %s1914_s30 = smov (%p28_p0, %s27_s30), 0  ;;  %s1916_s6 = smov (!%p28_p0, %s30_s6), %s1545_s26 }
   0xf   : > { %1897 = sst [smem:[#allocation14_spill]] %s1914_s30  ;;  %p138_p1 = scmp.ne.s32.totalorder %s1529_s22, %s1525_s21 }
  0x10   : > { %p139_p2 = scmp.eq.s32.totalorder %s1549_s27, 0  ;;  %p32_p3 = scmp.ge.s32.totalorder %s1916_s6, 2 }
  0x11   : > { %s187_s10 = sadd.s32 1, %s1521_s20  ;;  %p197_p5 = scmp.ne.s32.totalorder %s1521_s20, %s1517_s19 }
  0x12   : > { %p1650_p4 = por %p139_p2, %p138_p1  ;;  %s1918_s6 = smov (%p32_p3, %s1916_s6), 0 }
  0x13   : > { %1899 = sst [smem:[#allocation15_spill]] %s1918_s6  ;;  %p198_p6 = scmp.eq.s32.totalorder %s1202_s28, 7 }
  0x14   : > { %p203_p7 = scmp.ne.s32.totalorder %s1517_s19, %s1513_s18  ;;  %s1211_s12 = sshll.u32 %s1918_s6, 2 }
  0x15   : > { %s184_s13 = ssub.s32 %s1545_s26, %s1918_s6  ;;  %s127_s14 = sadd.s32 %s1211_s12, %s1914_s30 }
  0x16   : > { %p185_p8 = scmp.eq.s32.totalorder %s184_s13, 0  ;;  %s128_s15 = ssub.s32 %s1640_s8, %s127_s14 }
  0x17   : > { %p1665_p9 = por %p198_p6, %p197_p5  ;;  %p129_p10 = scmp.eq.s32.totalorder %s128_s15, 0 }
  0x18   : > { %p204_p11 = scmp.eq.s32.totalorder %s1203_s29, 7  ;;  %p1215_p13 = scmp.ge.s32.totalorder %s1549_s27, 8 }
  0x19   : > { %s1670_s17 = scalar_select %p185_p8, %s1521_s20, %s187_s10  }
  0x1a   : > { %s1673_s7 = scalar_select %p129_p10, %s1529_s22, %s131_s9  }
  0x1b   : > { %p1675_p12 = por %p204_p11, %p203_p7  ;;  %220 = sbr.rel (%p1215_p13) target bundleno = 64 (0x40), region = 16 }
  0x20   : > { %256 = sbr.rel (!%p1650_p4) target bundleno = 48 (0x30), region = 32  ;;  %s258_s28 = sand.u32 (%p1650_p4), 1, %s1529_s22  }
  0x21   : > { %s1217_s12 = sshll.u32 (%p1650_p4), %s1640_s8, 3  ;;  %s1233_s13 = smul.u32 (%p1650_p4), 48, %s258_s28 }
  0x22   : > { %s1902_s3 = sld [smem:[#allocation16_spill]] (%p1650_p4) }
  0x23   : > { %s260_s14 = scalar_lea.vmem (%p1650_p4), [#allocation7], %s1233_s13 }
  0x28   : > { %s264_s9 = scalar_lea.vmem %s1902_s3, %s1217_s12 }
  0x29   : > { %v303_v0 = vld [vmem:[%s264_s9] sm:$0xff] }
  0x2a   : > { %v305_v1 = vld [vmem:[%s264_s9 + $0x40] sm:$0xff]  ;;  %304 = vst [vmem:[%s260_s14] sm:$0xff] %v303_v0 }
  0x2b   : > { %v307_v2 = vld [vmem:[%s264_s9 + $0x80] sm:$0xff]  ;;  %306 = vst [vmem:[%s260_s14 + $0x8] sm:$0xff] %v305_v1 }
  0x2c   : > { %v309_v3 = vld [vmem:[%s264_s9 + $0xc0] sm:$0xff]  ;;  %308 = vst [vmem:[%s260_s14 + $0x10] sm:$0xff] %v307_v2 }
  0x2d   : > { %v311_v4 = vld [vmem:[%s264_s9 + $0x100] sm:$0xff]  ;;  %310 = vst [vmem:[%s260_s14 + $0x18] sm:$0xff] %v309_v3 }
  0x2e   : > { %v313_v5 = vld [vmem:[%s264_s9 + $0x140] sm:$0xff]  ;;  %312 = vst [vmem:[%s260_s14 + $0x20] sm:$0xff] %v311_v4 }
  0x2f   : > { %314 = vst [vmem:[%s260_s14 + $0x28] sm:$0xff] %v313_v5 }
  0x30 PF: > { %320 = sbr.rel (!%p1650_p4) target bundleno = 64 (0x40), region = 70  ;;  %s322_s15 = sand.u32 (%p1650_p4), 1, %s1529_s22  }
  0x31   : > { %s1219_s28 = sshll.u32 (%p1650_p4), %s1640_s8, 3  ;;  %s1234_s12 = smul.u32 (%p1650_p4), 48, %s322_s15 }
  0x32   : > { %s1903_s4 = sld [smem:[#allocation17_spill]] (%p1650_p4) }
  0x33   : > { %s324_s13 = scalar_lea.vmem (%p1650_p4), [#allocation8], %s1234_s12 }
  0x38   : > { %s328_s9 = scalar_lea.vmem %s1903_s4, %s1219_s28 }
  0x39   : > { %v367_v6 = vld [vmem:[%s328_s9] sm:$0xff] }
  0x3a   : > { %v369_v7 = vld [vmem:[%s328_s9 + $0x40] sm:$0xff]  ;;  %368 = vst [vmem:[%s324_s13] sm:$0xff] %v367_v6 }
  0x3b   : > { %v371_v8 = vld [vmem:[%s328_s9 + $0x80] sm:$0xff]  ;;  %370 = vst [vmem:[%s324_s13 + $0x8] sm:$0xff] %v369_v7 }
  0x3c   : > { %v373_v9 = vld [vmem:[%s328_s9 + $0xc0] sm:$0xff]  ;;  %372 = vst [vmem:[%s324_s13 + $0x10] sm:$0xff] %v371_v8 }
  0x3d   : > { %v375_v10 = vld [vmem:[%s328_s9 + $0x100] sm:$0xff]  ;;  %374 = vst [vmem:[%s324_s13 + $0x18] sm:$0xff] %v373_v9 }
  0x3e   : > { %v377_v11 = vld [vmem:[%s328_s9 + $0x140] sm:$0xff]  ;;  %376 = vst [vmem:[%s324_s13 + $0x20] sm:$0xff] %v375_v10 }
  0x3f   : > { %378 = vst [vmem:[%s324_s13 + $0x28] sm:$0xff] %v377_v11 }
  0x40 PF: > { %p1220_p0 = scmp.ge.s32.totalorder %s1549_s27, 1  ;;  %p383_p1 = scmp.lt.s32.totalorder %s1549_s27, 9 }
  0x42   : > { %p384_p2 = pnand %p1220_p0, %p383_p1 }
  0x43   : > { %s390_s8 = sand.u32 (!%p384_p2), 1, %s1525_s21   ;;  %s443_s11 = sand.u32 (!%p384_p2), 1, %s1517_s19  }
  0x44   : > { %387 = sbr.rel (%p384_p2) target bundleno = 579 (0x243), region = 108  ;;  %s1221_s15 = sshll.u32 (!%p384_p2), %s1537_s24, 2 }
  0x45   : > { %s1235_s14 = smul.u32 (!%p384_p2), 48, %s390_s8  ;;  %s446_s28 = sadd.s32 (!%p384_p2), %s1533_s23, %s1221_s15 }
  0x46   : > { %p447_p3 = scmp.lt.s32.totalorder (!%p384_p2), %s446_s28, 7  ;;  %s1715_s15 = scalar_lea.vmem (!%p384_p2), [#allocation9], %s443_s11 }
  0x47   : > { %s1709_s21 = scalar_lea.vmem (!%p384_p2), [#allocation7], %s1235_s14  ;;  %s1711_s8 = scalar_lea.vmem (!%p384_p2), [#allocation8], %s1235_s14 }
  0x48   : > { %p1227_p4 = scmp.ne.s32.totalorder (!%p384_p2), %s1533_s23, 0 }
  0x49   : > { %s1920_s28 = smov (!%p447_p3, %s446_s28), 7 }
  0x4a   : > { %s1222_s12 = sshll.u32 %s1920_s28, 1  ;;  %476 = sbr.rel (%p1227_p4) target bundleno = 83 (0x53), region = 120 }
  0x4b   : > { %s450_s9 = scalar_lea.vmem %s1883_s0, %s1222_s12  ;;  %s458_s4 = scalar_lea.vmem %s1884_s1, %s1222_s12 }
  0x4c   : > { %s466_s26 = scalar_lea.vmem %s1885_s2, %s1222_s12 }
  0x4f   : > { %vm477_vm0 = vcmask 0   ;;  %v1551_v12 = vmov 0.0  }
  0x50   : > { %478 = vst.msk [vmem:[#allocation2] sm:$0x1] %vm477_vm0, %v1551_v12  ;;  %479 = vst.msk [vmem:[#allocation3] sm:$0x1] %vm477_vm0, %v1551_v12 }
  0x51   : > { %480 = vst.msk [vmem:[#allocation4] sm:$0x1] %vm477_vm0, %v1551_v12  ;;  %481 = vst.msk [vmem:[#allocation5] sm:$0x1] %vm477_vm0, %v1551_v12 }
  0x52   : > { %482 = vst.msk [vmem:[#allocation6] sm:$0x1] %vm477_vm0, %v1551_v12 }
  0x53 PF: > { %v1718_v13 = vld [vmem:[%s458_s4] sm:$0x3]  ;;  %v766_v18 = vld [vmem:[%s1709_s21 + $0x1] sm:$0x1]  ;;  %vm892_vm2 = vcmask 1041408   ;;  %vm889_vm3 = vcmask 1041409  }
  0x54   : > { %v1720_v14 = vld [vmem:[%s466_s26] sm:$0x3]  ;;  %vm486_vm1 = vcmp.eq.f32.partialorder %v1718_v13, 0.0  ;;  %v767_v20 = vld [vmem:[%s1709_s21 + $0x19] sm:$0x1]  ;;  %vm973_vm4 = vcmask 1040384  }
  0x55   : > { %v483_v15 = vld [vmem:[%s450_s9] sm:$0x3]  ;;  %v1724_v16 = vsel %vm486_vm1, 0.002, %v1718_v13  ;;  %v768_v21 = vld [vmem:[%s1711_s8 + $0x1] sm:$0x1] }
  0x56   : > { %v492_v17 = vsub.f32 0.0, %v483_v15  ;;  %v1729_v19 = vmul.f32 %v1724_v16, %v1720_v14  ;;  %v769_v23 = vld [vmem:[%s1711_s8 + $0x19] sm:$0x1]  ;;  %v770_v24 = vsub.f32 %v766_v18, %v768_v21  ;;  %v776_v25 = vld [vmem:[%s1709_s21 + $0x2] sm:$0x1]  ;;  %vm922_vm5 = vcmask 0  }
  0x57   : > { %v771_v27 = vsub.f32 %v767_v20, %v769_v23  ;;  %v777_v28 = vld [vmem:[%s1709_s21 + $0x1a] sm:$0x1]  ;;  %v778_v29 = vld [vmem:[%s1711_s8 + $0x2] sm:$0x1]  ;;  %v786_v31 = vld [vmem:[%s1709_s21 + $0x4] sm:$0x1] }
  0x58   : > { %v493_v22 = vmul.f32 1.442695, %v492_v17  ;;  %v910_v26 = vsel %vm892_vm2, %v1729_v19, 0.0  ;;  %v779_v30 = vld [vmem:[%s1711_s8 + $0x1a] sm:$0x1]  ;;  %v772_v32 = vmul.f32 %v770_v24, %v770_v24  ;;  %v780_v33 = vsub.f32 %v776_v25, %v778_v29  ;;  %p1229_p5 = scmp.ne.s32.totalorder %s1533_s23, 3 }
  0x59   : > { %911 = vadd.xlane.f32.xlu0 %v910_v26  ;;  %v787_v34 = vld [vmem:[%s1709_s21 + $0x1c] sm:$0x1]  ;;  %v788_v35 = vld [vmem:[%s1711_s8 + $0x4] sm:$0x1]  ;;  %v773_v36 = vmul.f32 %v771_v27, %v771_v27  ;;  %v781_v37 = vsub.f32 %v777_v28, %v779_v30  ;;  %v796_v40 = vld [vmem:[%s1709_s21 + $0x5] sm:$0x1] }
  0x5a   : > { %1335 = vpow2.f32 %v493_v22  ;;  %v789_v38 = vld [vmem:[%s1711_s8 + $0x1c] sm:$0x1]  ;;  %v790_v39 = vsub.f32 %v786_v31, %v788_v35  ;;  %v797_v41 = vld [vmem:[%s1709_s21 + $0x1d] sm:$0x1]  ;;  %v782_v42 = vmul.f32 %v780_v33, %v780_v33  ;;  %v798_v44 = vld [vmem:[%s1711_s8 + $0x5] sm:$0x1] }
  0x5b   : > { %v791_v43 = vsub.f32 %v787_v34, %v789_v38  ;;  %v799_v45 = vld [vmem:[%s1711_s8 + $0x1d] sm:$0x1]  ;;  %v806_v46 = vld [vmem:[%s1709_s21 + $0x7] sm:$0x1]  ;;  %v783_v47 = vmul.f32 %v781_v37, %v781_v37  ;;  %v800_v49 = vsub.f32 %v796_v40, %v798_v44  ;;  %v807_v51 = vld [vmem:[%s1709_s21 + $0x1f] sm:$0x1] }
  0x5c   : > { %v792_v48 = vmul.f32 %v790_v39, %v790_v39  ;;  %v801_v50 = vsub.f32 %v797_v41, %v799_v45  ;;  %v808_v52 = vld [vmem:[%s1711_s8 + $0x7] sm:$0x1]  ;;  %v809_v53 = vld [vmem:[%s1711_s8 + $0x1f] sm:$0x1]  ;;  %v784_v54 = vadd.f32 %v782_v42, %v772_v32  ;;  %v816_v57 = vld [vmem:[%s1709_s21 + $0x8] sm:$0x1] }
  0x5d   : > { %v793_v55 = vmul.f32 %v791_v43, %v791_v43  ;;  %v810_v56 = vsub.f32 %v806_v46, %v808_v52  ;;  %v817_v58 = vld [vmem:[%s1709_s21 + $0x20] sm:$0x1]  ;;  %v818_v59 = vld [vmem:[%s1711_s8 + $0x8] sm:$0x1]  ;;  %v785_v60 = vadd.f32 %v783_v47, %v773_v36  ;;  %v802_v61 = vmul.f32 %v800_v49, %v800_v49  ;;  %v826_v1 = vld [vmem:[%s1709_s21 + $0xa] sm:$0x1] }
  0x5e   : > { %v803_v62 = vmul.f32 %v801_v50, %v801_v50  ;;  %v811_v63 = vsub.f32 %v807_v51, %v809_v53  ;;  %v819_v0 = vld [vmem:[%s1711_s8 + $0x20] sm:$0x1]  ;;  %v827_v2 = vld [vmem:[%s1709_s21 + $0x22] sm:$0x1]  ;;  %v794_v3 = vadd.f32 %v792_v48, %v784_v54  ;;  %v820_v5 = vsub.f32 %v816_v57, %v818_v59  ;;  %v828_v7 = vld [vmem:[%s1711_s8 + $0xa] sm:$0x1] }
  0x5f   : > { %v812_v4 = vmul.f32 %v810_v56, %v810_v56  ;;  %v821_v6 = vsub.f32 %v817_v58, %v819_v0  ;;  %v829_v8 = vld [vmem:[%s1711_s8 + $0x22] sm:$0x1]  ;;  %v836_v9 = vld [vmem:[%s1709_s21 + $0xb] sm:$0x1]  ;;  %v795_v10 = vadd.f32 %v793_v55, %v785_v60  ;;  %v830_v12 = vsub.f32 %v826_v1, %v828_v7  ;;  %v837_v17 = vld [vmem:[%s1709_s21 + $0x23] sm:$0x1] }
  0x60   : > { %v813_v11 = vmul.f32 %v811_v63, %v811_v63  ;;  %v831_v15 = vsub.f32 %v827_v2, %v829_v8  ;;  %v838_v18 = vld [vmem:[%s1711_s8 + $0xb] sm:$0x1]  ;;  %v839_v20 = vld [vmem:[%s1711_s8 + $0x23] sm:$0x1]  ;;  %v804_v21 = vadd.f32 %v802_v61, %v794_v3  ;;  %v822_v22 = vmul.f32 %v820_v5, %v820_v5  ;;  %v846_v24 = vld [vmem:[%s1709_s21 + $0xd] sm:$0x1] }
  0x61   : > { %v840_v23 = vsub.f32 %v836_v9, %v838_v18  ;;  %v847_v25 = vld [vmem:[%s1709_s21 + $0x25] sm:$0x1]  ;;  %v848_v26 = vld [vmem:[%s1711_s8 + $0xd] sm:$0x1]  ;;  %v805_v27 = vadd.f32 %v803_v62, %v795_v10  ;;  %v823_v28 = vmul.f32 %v821_v6, %v821_v6  ;;  %v841_v29 = vsub.f32 %v837_v17, %v839_v20  ;;  %v856_v31 = vld [vmem:[%s1709_s21 + $0xe] sm:$0x1] }
  0x62   : > { %v849_v30 = vld [vmem:[%s1711_s8 + $0x25] sm:$0x1]  ;;  %v814_v32 = vadd.f32 %v812_v4, %v804_v21  ;;  %v832_v33 = vmul.f32 %v830_v12, %v830_v12  ;;  %v850_v34 = vsub.f32 %v846_v24, %v848_v26  ;;  %v857_v35 = vld [vmem:[%s1709_s21 + $0x26] sm:$0x1]  ;;  %v858_v36 = vld [vmem:[%s1711_s8 + $0xe] sm:$0x1]  ;;  %v833_v39 = vmul.f32 %v831_v15, %v831_v15 }
  0x63   : > { %v859_v37 = vld [vmem:[%s1711_s8 + $0x26] sm:$0x1]  ;;  %v815_v38 = vadd.f32 %v813_v11, %v805_v27  ;;  %v851_v40 = vsub.f32 %v847_v25, %v849_v30  ;;  %v866_v41 = vld [vmem:[%s1709_s21 + $0x10] sm:$0x1]  ;;  %v842_v45 = vmul.f32 %v840_v23, %v840_v23  ;;  %v860_v46 = vsub.f32 %v856_v31, %v858_v36  ;;  %v867_v47 = vld [vmem:[%s1709_s21 + $0x28] sm:$0x1] }
  0x64   : > { %v868_v42 = vld [vmem:[%s1711_s8 + $0x10] sm:$0x1]  ;;  %v824_v44 = vadd.f32 %v822_v22, %v814_v32  ;;  %v869_v48 = vld [vmem:[%s1711_s8 + $0x28] sm:$0x1]  ;;  %v876_v49 = vld [vmem:[%s1709_s21 + $0x11] sm:$0x1]  ;;  %v843_v52 = vmul.f32 %v841_v29, %v841_v29  ;;  %v861_v53 = vsub.f32 %v857_v35, %v859_v37  ;;  %v852_v57 = vmul.f32 %v850_v34, %v850_v34 }
  0x65   : > { %v825_v51 = vadd.f32 %v823_v28, %v815_v38  ;;  %v878_v54 = vld [vmem:[%s1711_s8 + $0x11] sm:$0x1]  ;;  %v520_v55 = vld [vmem:[%s1709_s21] sm:$0x1]  ;;  %v870_v58 = vsub.f32 %v866_v41, %v868_v42  ;;  %v877_v59 = vld [vmem:[%s1709_s21 + $0x29] sm:$0x1]  ;;  %v853_v63 = vmul.f32 %v851_v40, %v851_v40  ;;  %v871_v0 = vsub.f32 %v867_v47, %v869_v48 }
  0x66   : > { %v834_v56 = vadd.f32 %v832_v33, %v824_v44  ;;  %v879_v60 = vld [vmem:[%s1711_s8 + $0x29] sm:$0x1]  ;;  %v521_v61 = vld [vmem:[%s1709_s21 + $0x18] sm:$0x1]  ;;  %v862_v2 = vmul.f32 %v860_v46, %v860_v46  ;;  %v880_v3 = vsub.f32 %v876_v49, %v878_v54  ;;  %v524_v4 = vsub.f32 0.0, %v520_v55 }
  0x67   : > { %v1336_v43 = vpop.eup %1335  ;;  %v835_v62 = vadd.f32 %v833_v39, %v825_v51  ;;  %v560_v5 = vld [vmem:[%s1709_s21 + $0x3] sm:$0x1]  ;;  %v863_v7 = vmul.f32 %v861_v53, %v861_v53  ;;  %v881_v8 = vsub.f32 %v877_v59, %v879_v60  ;;  %v525_v9 = vsub.f32 0.0, %v521_v61  ;;  %v561_v10 = vld [vmem:[%s1709_s21 + $0x1b] sm:$0x1] }
  0x68   : > { %v495_v50 = vadd.f32 1.0, %v1336_v43  ;;  %v844_v1 = vadd.f32 %v842_v45, %v834_v56  ;;  %v872_v12 = vmul.f32 %v870_v58, %v870_v58  ;;  %v526_v15 = vmul.f32 1.442695, %v524_v4  ;;  %v600_v22 = vld [vmem:[%s1709_s21 + $0x6] sm:$0x1] }
  0x69   : > { %v845_v6 = vadd.f32 %v843_v52, %v835_v62  ;;  %v873_v18 = vmul.f32 %v871_v0, %v871_v0  ;;  %v528_v20 = vmul.f32 1.442695, %v525_v9  ;;  %v564_v21 = vsub.f32 0.0, %v560_v5  ;;  %v601_v26 = vld [vmem:[%s1709_s21 + $0x1e] sm:$0x1] }
  0x6a   : > { %1337 = vrcp.f32 %v495_v50  ;;  %v854_v11 = vadd.f32 %v852_v57, %v844_v1  ;;  %v882_v24 = vmul.f32 %v880_v3, %v880_v3  ;;  %v565_v25 = vsub.f32 0.0, %v561_v10  ;;  %v640_v37 = vld [vmem:[%s1709_s21 + $0x9] sm:$0x1]  ;;  %v641_v38 = vld [vmem:[%s1709_s21 + $0x21] sm:$0x1] }
  0x6b   : > { %v855_v17 = vadd.f32 %v853_v63, %v845_v6  ;;  %1339 = vpow2.f32 %v526_v15  ;;  %v883_v28 = vmul.f32 %v881_v8, %v881_v8  ;;  %v566_v29 = vmul.f32 1.442695, %v564_v21  ;;  %v680_v40 = vld [vmem:[%s1709_s21 + $0xc] sm:$0x1]  ;;  %v720_v15 = vld [vmem:[%s1709_s21 + $0xf] sm:$0x1] }
  0x6c   : > { %v864_v23 = vadd.f32 %v862_v2, %v854_v11  ;;  %1341 = vpow2.f32 %v528_v20  ;;  %v1228_v30 = vadd.f32 -0.002, %v1718_v13  ;;  %v568_v32 = vmul.f32 1.442695, %v565_v25 }
  0x6d   : > { %v865_v27 = vadd.f32 %v863_v7, %v855_v17  ;;  %v604_v33 = vsub.f32 0.0, %v600_v22  ;;  %v1789_v34 = vmul.f32 %v1720_v14, %v1718_v13  ;;  %1343 = vpow2.f32 %v566_v29  ;;  %v681_v7 = vld [vmem:[%s1709_s21 + $0x24] sm:$0x1] }
  0x6e   : > { %v874_v31 = vadd.f32 %v872_v12, %v864_v23  ;;  %v605_v36 = vsub.f32 0.0, %v601_v26  ;;  %1345 = vpow2.f32 %v568_v32  ;;  %v490_v44 = vmax.f32 %v1228_v30, 0.0 }
  0x6f   : > { %v875_v35 = vadd.f32 %v873_v18, %v865_v27  ;;  %v606_v39 = vmul.f32 1.442695, %v604_v33  ;;  %v644_v45 = vsub.f32 0.0, %v640_v37  ;;  %v645_v46 = vsub.f32 0.0, %v641_v38 }
  0x70   : > { %v884_v41 = vadd.f32 %v882_v24, %v874_v31  ;;  %v608_v43 = vmul.f32 1.442695, %v605_v36  ;;  %v901_v13 = vmul.f32 %v1789_v34, %v1720_v14  ;;  %v684_v48 = vsub.f32 0.0, %v680_v40  ;;  %v721_v24 = vld [vmem:[%s1709_s21 + $0x27] sm:$0x1] }
  0x71   : > { %v885_v42 = vadd.f32 %v883_v28, %v875_v35  ;;  %1347 = vpow2.f32 %v606_v39  ;;  %v646_v50 = vmul.f32 1.442695, %v644_v45  ;;  %v648_v51 = vmul.f32 1.442695, %v645_v46 }
  0x72   : > { %1349 = vpow2.f32 %v608_v43  ;;  %v491_v54 = vadd.f32 0.001, %v490_v44  ;;  %v686_v55 = vmul.f32 1.442695, %v684_v48  ;;  %v902_v58 = vsel %vm892_vm2, %v901_v13, 0.0 }
  0x73   : > { %v888_v47 = vrot.slane %v885_v42, 7  ;;  %1351 = vpow2.f32 %v646_v50  ;;  %v903_v63 = vrot.slane %v902_v58, 4  ;;  %v685_v20 = vsub.f32 0.0, %v681_v7 }
  0x74   : > { %v508_v1 = vsub.f32 1.0, %v491_v54  ;;  %v501_v5 = vmul.f32 %v491_v54, %v491_v54  ;;  %v724_v27 = vsub.f32 0.0, %v720_v15  ;;  %v725_v33 = vsub.f32 0.0, %v721_v24 }
  0x75   : > { %v890_v53 = vsel %vm889_vm3, %v888_v47, %v884_v41  ;;  %v904_v9 = vadd.f32 %v903_v63, %v902_v58  ;;  %v688_v32 = vmul.f32 1.442695, %v685_v20 }
  0x76   : > { %v893_v57 = vsel %vm892_vm2, %v890_v53, 0.0  ;;  %v509_v12 = vmul.f32 %v508_v1, %v508_v1  ;;  %v502_v22 = vmul.f32 %v501_v5, %v501_v5  ;;  %v726_v41 = vmul.f32 1.442695, %v724_v27 }
  0x77   : > { %v1338_v49 = vpop.eup %1337  ;;  %v894_v62 = vrot.slane %v893_v57, 4  ;;  %v905_v26 = vrot.slane %v904_v9, 2  ;;  %v728_v46 = vmul.f32 1.442695, %v725_v33 }
  0x78   : > { %v498_v52 = vmax.f32 %v1338_v49, 1e-08  ;;  %v1340_v59 = vpop.eup %1339  ;;  %v510_v30 = vmul.f32 %v509_v12, %v509_v12 }
  0x79   : > { %v1342_v61 = vpop.eup %1341  ;;  %v530_v0 = vadd.f32 1.0, %v1340_v59  ;;  %v895_v8 = vadd.f32 %v894_v62, %v893_v57  ;;  %v906_v40 = vadd.f32 %v905_v26, %v904_v9 }
  0x7a   : > { %v499_v56 = vsub.f32 1.0, %v498_v52  ;;  %1353 = vlog2.f32 %v498_v52  ;;  %v531_v2 = vadd.f32 1.0, %v1342_v61  ;;  %v1344_v3 = vpop.eup %1343  ;;  %v507_v29 = vmul.f32 %v498_v52, %v498_v52 }
  0x7b   : > { %1355 = vpow2.f32 %v648_v51  ;;  %v1346_v4 = vpop.eup %1345  ;;  %v570_v6 = vadd.f32 1.0, %v1344_v3  ;;  %v896_v25 = vrot.slane %v895_v8, 2  ;;  %v907_v52 = vrot.slane %v906_v40, 1 }
  0x7c   : > { %v512_v60 = vmax.f32 %v499_v56, 1e-08  ;;  %1357 = vpow2.f32 %v686_v55  ;;  %v571_v10 = vadd.f32 1.0, %v1346_v4  ;;  %v500_v21 = vmul.f32 %v499_v56, %v499_v56 }
  0x7d   : > { %v897_v39 = vadd.f32 %v896_v25, %v895_v8  ;;  %v511_v43 = vmul.f32 %v510_v30, %v507_v29  ;;  %v908_v62 = vadd.f32 %v907_v52, %v906_v40 }
  0x7e   : > { %1359 = vlog2.f32 %v512_v60  ;;  %v1348_v11 = vpop.eup %1347  ;;  %v503_v36 = vmul.f32 %v502_v22, %v500_v21 }
  0x7f   : > { %1361 = vrcp.f32 %v530_v0  ;;  %v1350_v17 = vpop.eup %1349  ;;  %v610_v18 = vadd.f32 1.0, %v1348_v11  ;;  %v898_v51 = vrot.slane %v897_v39, 1 }
  0x80   : > { %1363 = vrcp.f32 %v531_v2  ;;  %v611_v23 = vadd.f32 1.0, %v1350_v17  ;;  %v1352_v28 = vpop.eup %1351 }
  0x81   : > { %1365 = vrcp.f32 %v570_v6  ;;  %v650_v38 = vadd.f32 1.0, %v1352_v28  ;;  %v899_v61 = vadd.f32 %v898_v51, %v897_v39  ;;  %v562_v51 = vld [vmem:[%s1711_s8 + $0x3] sm:$0x1] }
  0x82   : > { %1367 = vrcp.f32 %v571_v10 }
  0x83   : > { %1369 = vrcp.f32 %v610_v18  ;;  %v972_v8 = vmul.f32 %v908_v62, %v899_v61  ;;  %v563_v61 = vld [vmem:[%s1711_s8 + $0x1b] sm:$0x1]  ;;  %v592_v62 = vsub.f32 1.0, %v562_v51 }
  0x84   : > { %1371 = vrcp.f32 %v611_v23 }
  0x85   : > { %1373 = vpow2.f32 %v688_v32  ;;  %v974_v24 = vsel %vm973_vm4, %v972_v8, 0.0 }
  0x86   : > { %1375 = vrcp.f32 %v650_v38 }
  0x87   : > { %v1354_v31 = vpop.eup %1353  ;;  %1377 = vpow2.f32 %v726_v41 }
  0x88   : > { %v1356_v35 = vpop.eup %1355  ;;  %v505_v37 = vmul.f32 0.6931472, %v1354_v31 }
  0x89   : > { %v1358_v42 = vpop.eup %1357  ;;  %v651_v44 = vadd.f32 1.0, %v1356_v35 }
  0x8a   : > { %v506_v13 = vmul.f32 %v505_v37, %v503_v36  ;;  %v690_v49 = vadd.f32 1.0, %v1358_v42  ;;  %v522_v37 = vld [vmem:[%s1711_s8] sm:$0x1] }
  0x8b   : > { %v1360_v45 = vpop.eup %1359  ;;  %1379 = vrcp.f32 %v651_v44 }
  0x8c   : > { %v1362_v47 = vpop.eup %1361  ;;  %v514_v48 = vmul.f32 0.6931472, %v1360_v45  ;;  %1381 = vpow2.f32 %v728_v46  ;;  %v523_v45 = vld [vmem:[%s1711_s8 + $0x18] sm:$0x1]  ;;  %v552_v46 = vsub.f32 1.0, %v522_v37 }
  0x8d   : > { %v1364_v50 = vpop.eup %1363  ;;  %v544_v53 = vsub.f32 1.0, %v1362_v47  ;;  %v536_v57 = vmax.f32 %v1362_v47, 1e-08  ;;  %1383 = vrcp.f32 %v690_v49 }
  0x8e   : > { %v515_v54 = vmul.f32 %v514_v48, %v511_v43  ;;  %v545_v55 = vsub.f32 1.0, %v1364_v50  ;;  %v1366_v56 = vpop.eup %1365  ;;  %v537_v63 = vmax.f32 %v1364_v50, 1e-08 }
  0x8f   : > { %v1368_v58 = vpop.eup %1367  ;;  %v546_v60 = vmax.f32 %v544_v53, 1e-08  ;;  %v584_v2 = vsub.f32 1.0, %v1366_v56  ;;  %1385 = vlog2.f32 %v536_v57  ;;  %v576_v6 = vmax.f32 %v1366_v56, 1e-08 }
  0x90   : > { %v516_v59 = vadd.f32 %v515_v54, %v506_v13  ;;  %v547_v1 = vmax.f32 %v545_v55, 1e-08  ;;  %v1370_v3 = vpop.eup %1369  ;;  %v585_v4 = vsub.f32 1.0, %v1368_v58  ;;  %v577_v9 = vmax.f32 %v1368_v58, 1e-08 }
  0x91   : > { %1387 = vlog2.f32 %v546_v60  ;;  %v1372_v7 = vpop.eup %1371  ;;  %v586_v11 = vmax.f32 %v584_v2, 1e-08  ;;  %v624_v12 = vsub.f32 1.0, %v1370_v3  ;;  %v616_v18 = vmax.f32 %v1370_v3, 1e-08 }
  0x92   : > { %v517_v0 = vmul.f32 %v516_v59, %v1724_v16  ;;  %1389 = vlog2.f32 %v537_v63  ;;  %v587_v15 = vmax.f32 %v585_v4, 1e-08  ;;  %v1374_v16 = vpop.eup %1373  ;;  %v625_v20 = vsub.f32 1.0, %v1372_v7  ;;  %v602_v63 = vld [vmem:[%s1711_s8 + $0x6] sm:$0x1] }
  0x93   : > { %1391 = vlog2.f32 %v547_v1  ;;  %v1376_v21 = vpop.eup %1375  ;;  %v617_v22 = vmax.f32 %v1372_v7, 1e-08  ;;  %v626_v25 = vmax.f32 %v624_v12, 1e-08  ;;  %v691_v26 = vadd.f32 1.0, %v1374_v16 }
  0x94   : > { %v518_v5 = vsub.f32 0.0, %v517_v0  ;;  %1393 = vlog2.f32 %v576_v6  ;;  %v1378_v23 = vpop.eup %1377  ;;  %v627_v28 = vmax.f32 %v625_v20, 1e-08  ;;  %v664_v29 = vsub.f32 1.0, %v1376_v21  ;;  %v642_v7 = vld [vmem:[%s1711_s8 + $0x9] sm:$0x1] }
  0x95   : > { %1395 = vlog2.f32 %v577_v9  ;;  %v656_v31 = vmax.f32 %v1376_v21, 1e-08  ;;  %v730_v33 = vadd.f32 1.0, %v1378_v23  ;;  %v553_v55 = vsub.f32 1.0, %v523_v45 }
  0x96   : > { %v519_v10 = vmul.f32 %v518_v5, %v1720_v14  ;;  %1397 = vlog2.f32 %v586_v11  ;;  %v666_v38 = vmax.f32 %v664_v29, 1e-08  ;;  %v603_v5 = vld [vmem:[%s1711_s8 + $0x1e] sm:$0x1]  ;;  %v593_v11 = vsub.f32 1.0, %v563_v61 }
  0x97   : > { %1399 = vlog2.f32 %v587_v15  ;;  %v632_v12 = vsub.f32 1.0, %v602_v63 }
  0x98   : > { %v925_v17 = vsel %vm892_vm2, %v519_v10, 0.0  ;;  %v1380_v14 = vpop.eup %1379  ;;  %1401 = vlog2.f32 %v616_v18 }
  0x99   : > { %926 = vadd.xlane.f32.xlu0 %v925_v17  ;;  %v1382_v27 = vpop.eup %1381  ;;  %1403 = vlog2.f32 %v617_v22  ;;  %v665_v32 = vsub.f32 1.0, %v1380_v14  ;;  %v657_v41 = vmax.f32 %v1380_v14, 1e-08  ;;  %v633_v17 = vsub.f32 1.0, %v603_v5 }
  0x9a   : > { %v1384_v30 = vpop.eup %1383  ;;  %1405 = vlog2.f32 %v626_v25  ;;  %v731_v35 = vadd.f32 1.0, %v1382_v27  ;;  %v672_v25 = vsub.f32 1.0, %v642_v7 }
  0x9b   : > { %1407 = vrcp.f32 %v691_v26  ;;  %v704_v39 = vsub.f32 1.0, %v1384_v30  ;;  %v667_v43 = vmax.f32 %v665_v32, 1e-08  ;;  %v696_v47 = vmax.f32 %v1384_v30, 1e-08 }
  0x9c   : > { %v1386_v36 = vpop.eup %1385  ;;  %1409 = vlog2.f32 %v627_v28 }
  0x9d   : > { %975 = vadd.xlane.f32.xlu0 %v974_v24  ;;  %1411 = vlog2.f32 %v656_v31  ;;  %v539_v13 = vmul.f32 0.6931472, %v1386_v36  ;;  %v706_v49 = vmax.f32 %v704_v39, 1e-08 }
  0x9e   : > { %v1388_v40 = vpop.eup %1387  ;;  %1413 = vrcp.f32 %v730_v33 }
  0x9f   : > { %v1390_v42 = vpop.eup %1389  ;;  %1415 = vrcp.f32 %v731_v35  ;;  %v549_v48 = vmul.f32 0.6931472, %v1388_v40  ;;  %v542_v58 = vmul.f32 %v539_v13, %v522_v37  ;;  %v682_v13 = vld [vmem:[%s1711_s8 + $0xc] sm:$0x1] }
  0xa0   : > { %v1392_v44 = vpop.eup %1391  ;;  %1417 = vlog2.f32 %v666_v38  ;;  %v541_v53 = vmul.f32 0.6931472, %v1390_v42  ;;  %v643_v38 = vld [vmem:[%s1711_s8 + $0x21] sm:$0x1] }
  0xa1   : > { %v1394_v50 = vpop.eup %1393  ;;  %1419 = vlog2.f32 %v657_v41  ;;  %v551_v54 = vmul.f32 0.6931472, %v1392_v44  ;;  %v554_v59 = vmul.f32 %v552_v46, %v549_v48 }
  0xa2   : > { %v1396_v52 = vpop.eup %1395  ;;  %1421 = vlog2.f32 %v667_v43  ;;  %v543_v1 = vmul.f32 %v541_v53, %v523_v45  ;;  %v579_v3 = vmul.f32 0.6931472, %v1394_v50 }
  0xa3   : > { %v1398_v56 = vpop.eup %1397  ;;  %1423 = vlog2.f32 %v696_v47  ;;  %v555_v2 = vmul.f32 %v553_v55, %v551_v54  ;;  %v556_v9 = vadd.f32 %v554_v59, %v542_v58  ;;  %v581_v10 = vmul.f32 0.6931472, %v1396_v52 }
  0xa4   : > { %v1400_v57 = vpop.eup %1399  ;;  %1425 = vlog2.f32 %v706_v49  ;;  %v589_v4 = vmul.f32 0.6931472, %v1398_v56  ;;  %v582_v23 = vmul.f32 %v579_v3, %v562_v51  ;;  %v673_v56 = vsub.f32 1.0, %v643_v38 }
  0xa5   : > { %v1402_v60 = vpop.eup %1401  ;;  %v591_v16 = vmul.f32 0.6931472, %v1400_v57  ;;  %v557_v22 = vadd.f32 %v555_v2, %v543_v1  ;;  %v558_v30 = vsub.f32 0.0, %v556_v9  ;;  %v583_v31 = vmul.f32 %v581_v10, %v563_v61 }
  0xa6   : > { %v1404_v0 = vpop.eup %1403  ;;  %v594_v24 = vmul.f32 %v592_v62, %v589_v4  ;;  %v619_v26 = vmul.f32 0.6931472, %v1402_v60  ;;  %v712_v62 = vsub.f32 1.0, %v682_v13 }
  0xa7   : > { %v1406_v6 = vpop.eup %1405  ;;  %v595_v36 = vmul.f32 %v593_v11, %v591_v16  ;;  %v621_v37 = vmul.f32 0.6931472, %v1404_v0  ;;  %v559_v53 = vsub.f32 0.0, %v557_v22 }
  0xa8   : > { %v1408_v8 = vpop.eup %1407  ;;  %v629_v27 = vmul.f32 0.6931472, %v1406_v6  ;;  %v596_v45 = vadd.f32 %v594_v24, %v582_v23  ;;  %v622_v46 = vmul.f32 %v619_v26, %v602_v63 }
  0xa9   : > { %v1410_v15 = vpop.eup %1409  ;;  %v697_v18 = vmax.f32 %v1408_v8, 1e-08  ;;  %v705_v20 = vsub.f32 1.0, %v1408_v8  ;;  %v597_v54 = vadd.f32 %v595_v36, %v583_v31  ;;  %v623_v55 = vmul.f32 %v621_v37, %v603_v5  ;;  %v683_v5 = vld [vmem:[%s1711_s8 + $0x24] sm:$0x1] }
  0xaa   : > { %v1412_v21 = vpop.eup %1411  ;;  %v631_v41 = vmul.f32 0.6931472, %v1410_v15  ;;  %v634_v47 = vmul.f32 %v632_v12, %v629_v27  ;;  %v598_v60 = vsub.f32 %v558_v30, %v596_v45 }
  0xab   : > { %v1414_v14 = vpop.eup %1413  ;;  %1427 = vlog2.f32 %v697_v18  ;;  %v707_v28 = vmax.f32 %v705_v20, 1e-08  ;;  %v659_v49 = vmul.f32 0.6931472, %v1412_v21  ;;  %v599_v3 = vsub.f32 %v559_v53, %v597_v54  ;;  %v722_v18 = vld [vmem:[%s1711_s8 + $0xf] sm:$0x1] }
  0xac   : > { %v1416_v29 = vpop.eup %1415  ;;  %v736_v32 = vmax.f32 %v1414_v14, 1e-08  ;;  %v744_v33 = vsub.f32 1.0, %v1414_v14  ;;  %v635_v57 = vmul.f32 %v633_v17, %v631_v41  ;;  %v636_v61 = vadd.f32 %v634_v47, %v622_v46 }
  0xad   : > { %v1418_v35 = vpop.eup %1417  ;;  %1429 = vlog2.f32 %v707_v28  ;;  %v737_v39 = vmax.f32 %v1416_v29, 1e-08  ;;  %v745_v42 = vsub.f32 1.0, %v1416_v29  ;;  %v662_v63 = vmul.f32 %v659_v49, %v642_v7 }
  0xae   : > { %v1420_v40 = vpop.eup %1419  ;;  %1431 = vlog2.f32 %v736_v32  ;;  %v746_v43 = vmax.f32 %v744_v33, 1e-08  ;;  %v669_v50 = vmul.f32 0.6931472, %v1418_v35  ;;  %v637_v4 = vadd.f32 %v635_v57, %v623_v55 }
  0xaf   : > { %v1422_v44 = vpop.eup %1421  ;;  %1433 = vlog2.f32 %v737_v39  ;;  %v747_v51 = vmax.f32 %v745_v42, 1e-08  ;;  %v661_v58 = vmul.f32 0.6931472, %v1420_v40  ;;  %v638_v10 = vsub.f32 %v598_v60, %v636_v61 }
  0xb0   : > { %v1424_v48 = vpop.eup %1423  ;;  %1435 = vlog2.f32 %v746_v43  ;;  %v671_v59 = vmul.f32 0.6931472, %v1422_v44  ;;  %v674_v0 = vmul.f32 %v672_v25, %v669_v50  ;;  %v713_v17 = vsub.f32 1.0, %v683_v5  ;;  %v723_v25 = vld [vmem:[%s1711_s8 + $0x27] sm:$0x1] }
  0xb1   : > { %v1426_v52 = vpop.eup %1425  ;;  %1437 = vlog2.f32 %v747_v51  ;;  %v699_v1 = vmul.f32 0.6931472, %v1424_v48  ;;  %v663_v6 = vmul.f32 %v661_v58, %v643_v38  ;;  %v639_v7 = vsub.f32 %v599_v3, %v637_v4 }
  0xb2   : > { %v709_v2 = vmul.f32 0.6931472, %v1426_v52  ;;  %v675_v8 = vmul.f32 %v673_v56, %v671_v59  ;;  %v676_v11 = vadd.f32 %v674_v0, %v662_v63  ;;  %v752_v29 = vsub.f32 1.0, %v722_v18 }
  0xb3   : > { %v702_v12 = vmul.f32 %v699_v1, %v682_v13  ;;  %v753_v37 = vsub.f32 1.0, %v723_v25  ;;  %v761_v48 = vrot.slane %v1729_v19, 1  ;;  %v958_v55 = vsel %vm892_vm2, %v1789_v34, 0.0 }
  0xb4   : > { %v714_v15 = vmul.f32 %v712_v62, %v709_v2  ;;  %v677_v21 = vadd.f32 %v675_v8, %v663_v6  ;;  %v678_v26 = vsub.f32 %v638_v10, %v676_v11 }
  0xb6   : > { %v716_v27 = vadd.f32 %v714_v15, %v702_v12  ;;  %v679_v33 = vsub.f32 %v639_v7, %v677_v21 }
  0xb8   : > { %v1428_v9 = vpop.eup %1427  ;;  %v718_v40 = vsub.f32 %v678_v26, %v716_v27 }
  0xb9   : > { %v701_v16 = vmul.f32 0.6931472, %v1428_v9 }
  0xba   : > { %v1430_v20 = vpop.eup %1429 }
  0xbb   : > { %v1432_v22 = vpop.eup %1431  ;;  %v703_v23 = vmul.f32 %v701_v16, %v683_v5  ;;  %v711_v24 = vmul.f32 0.6931472, %v1430_v20 }
  0xbc   : > { %v1434_v14 = vpop.eup %1433  ;;  %v739_v28 = vmul.f32 0.6931472, %v1432_v22 }
  0xbd   : > { %v1436_v30 = vpop.eup %1435  ;;  %v715_v31 = vmul.f32 %v713_v17, %v711_v24  ;;  %v741_v32 = vmul.f32 0.6931472, %v1434_v14 }
  0xbe   : > { %v742_v35 = vmul.f32 %v739_v28, %v722_v18  ;;  %v749_v36 = vmul.f32 0.6931472, %v1436_v30  ;;  %v1438_v38 = vpop.eup %1437  ;;  %v924_v18 = vld [vmem:[#allocation3] sm:$0x1] }
  0xbf   : > { %v717_v39 = vadd.f32 %v715_v31, %v703_v23  ;;  %v743_v41 = vmul.f32 %v741_v32, %v723_v25  ;;  %v751_v42 = vmul.f32 0.6931472, %v1438_v38  ;;  %v971_v38 = vld [vmem:[#allocation6] sm:$0x1] }
  0xc0   : > { %v754_v43 = vmul.f32 %v752_v29, %v749_v36 }
  0xc1   : > { %v719_v44 = vsub.f32 %v679_v33, %v717_v39  ;;  %v755_v45 = vmul.f32 %v753_v37, %v751_v42  ;;  %v938_v33 = vld [vmem:[#allocation4] sm:$0x1]  ;;  %v957_v37 = vld [vmem:[#allocation5] sm:$0x1] }
  0xc2   : > { %v756_v46 = vadd.f32 %v754_v43, %v742_v35 }
  0xc3   : > { %v757_v47 = vadd.f32 %v755_v45, %v743_v41 }
  0xc4   : > { %v758_v13 = vsub.f32 %v718_v40, %v756_v46 }
  0xc5   : > { %v759_v49 = vsub.f32 %v719_v44, %v757_v47 }
  0xc6   : > { %v764_v50 = vmul.f32 %v758_v13, %v1729_v19  ;;  %v909_v19 = vld [vmem:[#allocation2] sm:$0x1] }
  0xc7   : > { %v765_v51 = vmul.f32 %v761_v48, %v759_v49 }
  0xc9   : > { %v941_v52 = vrot.slane %v765_v51, 7 }
  0xcb   : > { %v942_v53 = vsel %vm889_vm3, %v941_v52, %v764_v50 }
  0xcc   : > { %v944_v54 = vsel %vm892_vm2, %v942_v53, 0.0 }
  0xcd   : > { %945 = vadd.xlane.f32.xlu1 %v944_v54 }
  0xd1   : > { %959 = vadd.xlane.f32.xlu1 %v958_v55 }
  0xe2   : > { %v912_v56 = vpop.xlane.xlu0 %911 }
  0xe3   : > { %v913_v57 = vrot.slane %v912_v56, 4 }
  0xe5   : > { %v914_v58 = vadd.f32 %v913_v57, %v912_v56 }
  0xe7   : > { %v915_v59 = vrot.slane %v914_v58, 2 }
  0xe9   : > { %v916_v60 = vadd.f32 %v915_v59, %v914_v58 }
  0xeb   : > { %v917_v61 = vrot.slane %v916_v60, 1 }
  0xed   : > { %v918_v62 = vadd.f32 %v917_v61, %v916_v60 }
  0xef   : > { %1236 = vpush %v918_v62 }
 0x120   : > { %s1237_s3 = spop %1236 }
 0x121   : > { %v920_v0 = vstv %s1237_s3 }
 0x122   : > { %v927_v63 = vpop.xlane.xlu0 %926  ;;  %v921_v2 = vadd.f32 %v920_v0, %v909_v19 }
 0x123   : > { %v928_v1 = vrot.slane %v927_v63, 4 }
 0x124   : > { %923 = vst.msk [vmem:[#allocation2] sm:$0x1] %vm922_vm5, %v921_v2 }
 0x125   : > { %v929_v3 = vadd.f32 %v928_v1, %v927_v63 }
 0x126   : > { %v976_v5 = vpop.xlane.xlu0 %975 }
 0x127   : > { %v930_v34 = vrot.slane %v929_v3, 2  ;;  %v977_v9 = vrot.slane %v976_v5, 4 }
 0x129   : > { %v931_v4 = vadd.f32 %v930_v34, %v929_v3  ;;  %v978_v10 = vadd.f32 %v977_v9, %v976_v5 }
 0x12b   : > { %v932_v6 = vrot.slane %v931_v4, 1  ;;  %v979_v16 = vrot.slane %v978_v10, 2 }
 0x12d   : > { %v933_v8 = vadd.f32 %v932_v6, %v931_v4  ;;  %v980_v25 = vadd.f32 %v979_v16, %v978_v10 }
 0x12f   : > { %1238 = vpush %v933_v8  ;;  %v981_v29 = vrot.slane %v980_v25, 1 }
 0x131   : > { %v982_v32 = vadd.f32 %v981_v29, %v980_v25 }
 0x156   : > { %v946_v11 = vpop.xlane.xlu1 %945 }
 0x157   : > { %v947_v12 = vrot.slane %v946_v11, 4 }
 0x159   : > { %v948_v15 = vadd.f32 %v947_v12, %v946_v11 }
 0x15a   : > { %v960_v17 = vpop.xlane.xlu1 %959 }
 0x15b   : > { %v949_v20 = vrot.slane %v948_v15, 2  ;;  %v961_v7 = vrot.slane %v960_v17, 4 }
 0x15d   : > { %v962_v22 = vadd.f32 %v961_v7, %v960_v17  ;;  %v950_v23 = vadd.f32 %v949_v20, %v948_v15 }
 0x15f   : > { %v963_v14 = vrot.slane %v962_v22, 2  ;;  %v951_v26 = vrot.slane %v950_v23, 1 }
 0x160   : > { %s1239_s4 = spop %1238 }
 0x161   : > { %v935_v21 = vstv %s1239_s4  ;;  %v964_v27 = vadd.f32 %v963_v14, %v962_v22  ;;  %v952_v28 = vadd.f32 %v951_v26, %v950_v23 }
 0x162   : > { %v936_v24 = vadd.f32 %v935_v21, %v924_v18 }
 0x163   : > { %1240 = vpush %v952_v28  ;;  %v965_v30 = vrot.slane %v964_v27, 1 }
 0x164   : > { %937 = vst.msk [vmem:[#allocation3] sm:$0x1] %vm922_vm5, %v936_v24 }
 0x165   : > { %v966_v31 = vadd.f32 %v965_v30, %v964_v27 }
 0x167   : > { %1242 = vpush %v966_v31 }
 0x168   : > { %1244 = vpush %v982_v32 }
 0x194   : > { %s1241_s26 = spop %1240 }
 0x195   : > { %v954_v35 = vstv %s1241_s26 }
 0x196   : > { %v955_v36 = vadd.f32 %v954_v35, %v938_v33 }
 0x198   : > { %956 = vst.msk [vmem:[#allocation4] sm:$0x1] %vm922_vm5, %v955_v36  ;;  %s1243_s30 = spop %1242 }
 0x199   : > { %v968_v39 = vstv %s1243_s30  ;;  %s1245_s6 = spop %1244  ;;  %990 = sbr.rel (%p1229_p5) target bundleno = 556 (0x22c), region = 124 }
 0x19a   : > { %v969_v40 = vadd.f32 %v968_v39, %v957_v37  ;;  %v984_v41 = vstv %s1245_s6 }
 0x19b   : > { %v985_v42 = vadd.f32 %v984_v41, %v971_v38 }
 0x19c   : > { %970 = vst.msk [vmem:[#allocation5] sm:$0x1] %vm922_vm5, %v969_v40 }
 0x19d   : > { %986 = vst.msk [vmem:[#allocation6] sm:$0x1] %vm922_vm5, %v985_v42 }
 0x19e   : > { %v994_v44 = vld [vmem:[#allocation2] sm:$0x1]  ;;  %v1552_v45 = vmov 0   ;;  %v1006_v47 = vld [vmem:[#allocation3] sm:$0x1]  ;;  %v991_v48 = vlaneseq  ;;  %vm1057_vm11 = vcmask 57344  }
 0x19f   : > { %v1019_v43 = vld [vmem:[#allocation4] sm:$0x1]  ;;  %1440 = vset.pattern.permute.xlu1 %v1552_v45  ;;  %1439 = vset.pattern.permute.xlu0 %v1552_v45 }
 0x1a0   : > { %1022 = vperm.xlu1 %1440, %v1019_v43   ;;  %997 = vperm.xlu0 %1439, %v994_v44   ;;  %v1001_v49 = vshrl.u32 %v991_v48, 7  ;;  %v992_v52 = vand.u32 127, %v991_v48 }
 0x1a2   : > { %v1002_v50 = vsub.s32 0, %v1001_v49  ;;  %vm993_vm6 = vcmp.eq.s32.totalorder %v992_v52, 0  ;;  %vm1005_vm7 = vcmp.eq.s32.totalorder %v992_v52, 1  ;;  %vm1018_vm8 = vcmp.eq.s32.totalorder %v992_v52, 2 }
 0x1a3   : > { %v1032_v46 = vld [vmem:[#allocation5] sm:$0x1]  ;;  %vm1031_vm9 = vcmp.eq.s32.totalorder %v992_v52, 3  ;;  %vm1044_vm10 = vcmp.eq.s32.totalorder %v992_v52, 4 }
 0x1a4   : > { %1035 = vperm.xlu1 %1440, %v1032_v46   ;;  %1009 = vperm.xlu0 %1439, %v1006_v47   ;;  %v1045_v13 = vld [vmem:[#allocation6] sm:$0x1] }
 0x1a8   : > { %1048 = vperm.xlu0 %1439, %v1045_v13  }
 0x21b   : > { %v1023_v51 = vpop.permute.xlu1 %1022  ;;  %v998_v53 = vpop.permute.xlu0 %997 }
 0x21c   : > { %v1003_v54 = vrot.slane %v998_v53, %v1002_v50  ;;  %v1028_v57 = vrot.slane %v1023_v51, %v1002_v50 }
 0x21e   : > { %v1004_v59 = vsel %vm993_vm6, %v1003_v54, 0.0  ;;  %v1029_v63 = vsel %vm1018_vm8, %v1028_v57, 0.0 }
 0x21f   : > { %v1036_v55 = vpop.permute.xlu1 %1035  ;;  %v1010_v56 = vpop.permute.xlu0 %1009 }
 0x220   : > { %v1015_v58 = vrot.slane %v1010_v56, %v1002_v50  ;;  %v1041_v60 = vrot.slane %v1036_v55, %v1002_v50 }
 0x222   : > { %v1016_v61 = vsel %vm1005_vm7, %v1015_v58, 0.0  ;;  %v1042_v2 = vsel %vm1031_vm9, %v1041_v60, 0.0 }
 0x223   : > { %v1017_v62 = vadd.f32 %v1016_v61, %v1004_v59  ;;  %v1049_v19 = vpop.permute.xlu0 %1048 }
 0x224   : > { %v1054_v0 = vrot.slane %v1049_v19, %v1002_v50 }
 0x225   : > { %v1030_v1 = vadd.f32 %v1029_v63, %v1017_v62 }
 0x226   : > { %v1055_v34 = vsel %vm1044_vm10, %v1054_v0, 0.0 }
 0x227   : > { %v1043_v3 = vadd.f32 %v1042_v2, %v1030_v1 }
 0x229   : > { %v1056_v4 = vadd.f32 %v1055_v34, %v1043_v3 }
 0x22b   : > { %1058 = vst.msk [vmem:[%s1715_s15] sm:$0x1] %vm1057_vm11, %v1056_v4 }
 0x22c PF: > { %s1230_s23 = sshll.u32 %s1537_s24, 4  ;;  %s1072_s29 = sshll.u32 %s1715_s15, 4  ;;  %s1073_s29 = int_to_ptr.vmem [resolvable:$true] %s1072_s29 }
 0x22d   : > { %s1070_s12 = scalar_lea.hbm %s1888_s5, %s1230_s23  ;;  %s1060_s10 = scalar_lea.sflag [#allocation10], %s443_s11 }
 0x22e   : > { %s1441_s9 = scalar_lea.vmem %s1073_s29, 16  ;;  %s1553_s13 = smov [#allocation9]  }
 0x22f   : > { %p1442_p6 = scmp.ne.s32.totalorder %s1073_s29, %s1441_s9  ;;  %s1445_s21 = sshll.u32 %s1553_s13, 4  ;;  %s1446_s21 = int_to_ptr.vmem [resolvable:$false] %s1445_s21 }
 0x230   : > { %s1447_s8 = scalar_lea.vmem %s1446_s21, 32  ;;  %p1448_p10 = scmp.lt.s32.totalorder %s1073_s29, %s1446_s21 }
 0x231   : > { %p1443_p7 = pnand %p1442_p6, %p1665_p9  ;;  %p1449_p11 = scmp.lt.s32.totalorder %s1447_s8, %s1441_s9 }
 0x233   : > { %p1444_p8 = pneg %p1443_p7  ;;  %p1450_p13 = por %p1449_p11, %p1448_p10 }
 0x235   : > { %p1451_p0 = pnand %p1450_p13, %p1444_p8 }
 0x237   : > { %1454 = shalt.err (!%p1451_p0)
}
 0x238   : > { %s1455_s24 = scalar_lea.hbm %s1070_s12, 16  ;;  %s1459_s3 = scalar_lea.hbm %s1888_s5, 32 }
 0x239   : > { %p1456_p1 = scmp.ne.s32.totalorder %s1070_s12, %s1455_s24  ;;  %p1460_p4 = scmp.lt.s32.totalorder %s1070_s12, %s1888_s5 }
 0x23a   : > { %p1461_p5 = scmp.lt.s32.totalorder %s1459_s3, %s1455_s24 }
 0x23b   : > { %p1457_p2 = pnand %p1456_p1, %p1665_p9 }
 0x23c   : > { %p1462_p6 = por %p1461_p5, %p1460_p4 }
 0x23d   : > { %p1458_p3 = pneg %p1457_p2 }
 0x23f   : > { %p1463_p7 = pnand %p1462_p6, %p1458_p3 }
 0x241   : > { %1466 = shalt.err (!%p1463_p7)
}
 0x242   : > { %1246 = dma.vmem_to_hbm [thread:$0]  (%p1665_p9), %s1073_s29, 16, %s1070_s12, %s1060_s10  }
 0x243 PF: > { %p1252_p8 = scmp.ge.s32.totalorder %s1549_s27, 2  ;;  %s1084_s30 = sand.u32 1, %s1513_s18  }
 0x244   : > { %s1085_s6 = scalar_lea.sflag [#allocation10], %s1084_s30 }
 0x245   : > { %p1249_p10 = pnand %p1252_p8, %p1675_p12 }
 0x247   : > { %p1250_p11 = pneg %p1249_p10 }
 0x249   : > { %1508 = dma.done.wait (%p1250_p11), %s1085_s6, 16  }
 0x24a   : > { %1510 = vsyncadd (%p1250_p11), %s1085_s6, 4294967280  ;;  %s18_s27 = sadd.s32 1, %s1549_s27   ;;  %s1904_s23 = sld [smem:[#allocation12_spill]] }
 0x24b   : > { %p15_p13 = scmp.ge.s32.totalorder %s18_s27, 10   ;;  %s1905_s24 = sld [smem:[#allocation13_spill]] }
 0x24c   : > { %s1906_s25 = sld [smem:[#allocation14_spill]]  ;;  %s1908_s18 = smov %s1517_s19 }
 0x24d   : > { %s1907_s26 = sld [smem:[#allocation15_spill]]  ;;  %s1909_s19 = smov %s1521_s20 }
 0x24e   : > { %s1910_s20 = smov %s1670_s17  ;;  %s1911_s21 = smov %s1529_s22 }
 0x24f   : > { %s1912_s22 = smov %s1673_s7  ;;  %17 = sbr.rel (!%p15_p13) target bundleno = 9 (0x9), region = 181 }
 0x254   :  { %1089 = vsyncpa [#allocation10], 1 }
 0x255   :  { %1091 = vsyncpa [#allocation10 + $0x1], 1 }

</bundles_post_ra>
